<compile_context>
chip_gen: v7x
topology: tpu7x:2x2x1
jax: 0.10.0
libtpu: 0.0.40
codegen_flags: <defaults>
</compile_context>

<pallas_src>
import numpy as np
import jax
import jax.numpy as jnp
from jax.experimental import pallas as pl
from jax.experimental.pallas import tpu as pltpu

SIGMA = 25.0


def _round_up(x, m):
    return ((x + m - 1) // m) * m


def _gelu_tanh(x):
    # tanh-approximate GELU: the tanh runs on the EUP transcendental slot,
    # leaving the VALU free.  Deviates from torch.nn.GELU()'s exact erf form
    # by ~1e-3 relative — an explicit, documented approximation choice.
    c = np.sqrt(2.0 / np.pi)
    return 0.5 * x * (1.0 + jnp.tanh(c * (x + 0.044715 * (x * x * x))))


def sn_model_kernel(t_ref, x_ref, wf_ref,
                    w_emb_sin_ref, w_emb_cos_ref, b_emb_ref,
                    w_el_ref, b_el_ref,
                    w1_ref, b1_ref,
                    w2a_ref, b2a_ref,
                    w2b_ref, b2b_ref,
                    w2c_ref, b2c_ref,
                    out_ref):
    bf16 = jnp.bfloat16
    t = t_ref[...]                                   # (TB, 1) f32

    # GaussianFourierProjection: t[:, None] * (W * 2*pi) -> [sin, cos]
    # (2*pi already folded into wf in the wrapper)
    x_proj = t * wf_ref[...]                         # (TB, E/2) f32
    sin_p = jnp.sin(x_proj).astype(bf16)
    cos_p = jnp.cos(x_proj).astype(bf16)

    # Linear(embed_dim, embed_dim) over concat([sin, cos]) as two half-matmuls
    # against pre-split weights (avoids lane concat and in-kernel tile slicing).
    emb = (jnp.dot(sin_p, w_emb_sin_ref[...], preferred_element_type=jnp.float32)
           + jnp.dot(cos_p, w_emb_cos_ref[...], preferred_element_type=jnp.float32)
           + b_emb_ref[...])
    emb = emb * jax.nn.sigmoid(emb)                  # self.act = swish (f32)

    # embedding_layer: Dense(embed_dim, 256)
    emb256 = (jnp.dot(emb.astype(bf16), w_el_ref[...],
                      preferred_element_type=jnp.float32) + b_el_ref[...])

    # linear_model1: Linear(dim, 256) -> Dropout(id) -> GELU
    h = (jnp.dot(x_ref[...].astype(bf16), w1_ref[...],
                 preferred_element_type=jnp.float32) + b1_ref[...])
    h = _gelu_tanh(h) + emb256

    # linear_model2: Linear(256,512)->GELU -> Linear(512,512)->GELU -> Linear(512,dim)
    h = _gelu_tanh(jnp.dot(h.astype(bf16), w2a_ref[...],
                           preferred_element_type=jnp.float32) + b2a_ref[...])
    h = _gelu_tanh(jnp.dot(h.astype(bf16), w2b_ref[...],
                           preferred_element_type=jnp.float32) + b2b_ref[...])
    out = (jnp.dot(h.astype(bf16), w2c_ref[...],
                   preferred_element_type=jnp.float32) + b2c_ref[...])   # (TB, dim_pad)

    # marginal_prob_std(t) = sqrt((sigma**(2t) - 1) / (2 * ln(sigma)))
    # divide by std  ==  multiply by rsqrt(denom)  (rsqrt runs on the EUP slot)
    log_sigma = np.log(SIGMA)
    denom = (jnp.exp((2.0 * log_sigma) * t) - 1.0) * (1.0 / (2.0 * log_sigma))  # (TB, 1)
    out_ref[...] = out * jax.lax.rsqrt(denom)


def sn_model_forward(t, x, p, *, batch_tile=1024):
    """t: (B,) float32, x: (B, dim) float32 -> (B, dim) float32."""
    B, dim = x.shape
    E = p["w_embed"].shape[0]
    half = E // 2
    dim_in_pad = _round_up(max(dim, 128), 128)       # lane-dense x tile
    dim_out_pad = _round_up(max(dim, 128), 128)      # lane-dense output slab

    # Batch tile: multiple of 16 (bf16 LHS sublane pack).  Cap at ceil(B/2)
    # (rounded up) so the grid has >= 2 steps whenever B allows, letting
    # dimension_semantics=("parallel",) shard across both v7x TensorCores.
    tb = min(batch_tile, max(16, _round_up(pl.cdiv(B, 2), 16)))
    Bp = _round_up(B, tb)

    # Padded batch rows use t=1.0 (NOT 0.0: t=0 makes denom=0 -> inf/NaN rows).
    t2 = jnp.pad(t.reshape(B, 1).astype(jnp.float32), ((0, Bp - B), (0, 0)),
                 constant_values=1.0)
    x2 = jnp.pad(x.astype(jnp.float32), ((0, Bp - B), (0, dim_in_pad - dim)))

    bf16 = jnp.bfloat16
    wf        = (p["W_fourier"] * (2.0 * np.pi)).astype(jnp.float32)   # fold 2*pi
    w_emb_sin = p["w_embed"][:half, :].astype(bf16)                    # pre-split
    w_emb_cos = p["w_embed"][half:, :].astype(bf16)
    w_el  = p["w_el"].astype(bf16)
    w1    = jnp.pad(p["w1"], ((0, dim_in_pad - dim), (0, 0))).astype(bf16)
    w2a   = p["w2a"].astype(bf16)
    w2b   = p["w2b"].astype(bf16)
    w2c   = jnp.pad(p["w2c"], ((0, 0), (0, dim_out_pad - dim))).astype(bf16)
    b2c   = jnp.pad(p["b2c"], ((0, 0), (0, dim_out_pad - dim))).astype(jnp.float32)
    b_emb, b_el, b1 = (p["b_embed"].astype(jnp.float32),
                       p["b_el"].astype(jnp.float32), p["b1"].astype(jnp.float32))
    b2a, b2b = p["b2a"].astype(jnp.float32), p["b2b"].astype(jnp.float32)

    args = (t2, x2, wf, w_emb_sin, w_emb_cos, b_emb, w_el, b_el,
            w1, b1, w2a, b2a, w2b, b2b, w2c, b2c)

    def tile_spec(shape):                            # per-grid-step batch tiles
        return pl.BlockSpec(shape, lambda i: (i, 0))

    def resident(a):                                 # weights/biases stay in VMEM
        return pl.BlockSpec(a.shape, lambda i: (0, 0))

    in_specs = ([tile_spec((tb, 1)), tile_spec((tb, dim_in_pad))]
                + [resident(a) for a in args[2:]])
    out_specs = pl.BlockSpec((tb, dim_out_pad), lambda i: (i, 0))

    # Advisory cost estimate for the XLA scheduler.
    macs = (half * E * 2 + E * 256 + dim_in_pad * 256
            + 256 * 512 + 512 * 512 + 512 * dim_out_pad)
    flops = int(2 * Bp * macs)
    transcendentals = int(Bp * (2 * half + E + 256 + 512 + 512 + 2))
    bytes_accessed = int(sum(int(np.prod(a.shape)) * a.dtype.itemsize for a in args)
                         + Bp * dim_out_pad * 4)

    out = pl.pallas_call(
        sn_model_kernel,
        grid=(Bp // tb,),
        in_specs=in_specs,
        out_specs=out_specs,
        out_shape=jax.ShapeDtypeStruct((Bp, dim_out_pad), jnp.float32),
        compiler_params=pltpu.CompilerParams(
            dimension_semantics=("parallel",),
            vmem_limit_bytes=48 * 1024 * 1024),       # headroom for tb=1024 on v5e
        cost_estimate=pl.CostEstimate(flops=flops,
                                      transcendentals=transcendentals,
                                      bytes_accessed=bytes_accessed),
    )(*args)
    return out[:B, :dim]


def init_params(key, embed_dim, dim):
    """Deterministic synthetic parameters (PyTorch Linear-like init); weights stored (in, out)."""
    ks = jax.random.split(key, 8)

    def lin(k, fan_in, fan_out):
        kw, kb = jax.random.split(k)
        bound = 1.0 / np.sqrt(fan_in)
        w = jax.random.uniform(kw, (fan_in, fan_out), jnp.float32, -bound, bound)
        b = jax.random.uniform(kb, (1, fan_out), jnp.float32, -bound, bound)
        return w, b

    p = {}
    p["W_fourier"] = jax.random.normal(ks[0], (1, embed_dim // 2), jnp.float32) * 30.0
    p["w_embed"], p["b_embed"] = lin(ks[1], embed_dim, embed_dim)
    p["w_el"],   p["b_el"]   = lin(ks[2], embed_dim, 256)
    p["w1"],     p["b1"]     = lin(ks[3], dim, 256)
    p["w2a"],    p["b2a"]    = lin(ks[4], 256, 512)
    p["w2b"],    p["b2b"]    = lin(ks[5], 512, 512)
    p["w2c"],    p["b2c"]    = lin(ks[6], 512, dim)
    return p


def reference_forward(t, x, p):
    """Pure-JAX reference mirroring the PyTorch forward (eval mode), f32, exact erf GELU."""
    x_proj = t[:, None] * p["W_fourier"] * (2.0 * np.pi)
    fourier = jnp.concatenate([jnp.sin(x_proj), jnp.cos(x_proj)], axis=-1)
    emb = fourier @ p["w_embed"] + p["b_embed"]
    emb = emb * jax.nn.sigmoid(emb)
    emb256 = emb @ p["w_el"] + p["b_el"]
    h = jax.nn.gelu(x @ p["w1"] + p["b1"], approximate=False)
    h = h + emb256
    h = jax.nn.gelu(h @ p["w2a"] + p["b2a"], approximate=False)
    h = jax.nn.gelu(h @ p["w2b"] + p["b2b"], approximate=False)
    out = h @ p["w2c"] + p["b2c"]
    std = jnp.sqrt((SIGMA ** (2.0 * t) - 1.0) / 2.0 / np.log(SIGMA))
    return out / std[:, None]


if __name__ == "__main__":
    B, DIM, EMBED_DIM = 8, 16, 32

    key = jax.random.PRNGKey(0)
    k_p, k_x, k_t = jax.random.split(key, 3)

    params = init_params(k_p, EMBED_DIM, DIM)
    x = jax.random.normal(k_x, (B, DIM), jnp.float32)
    t = jax.random.uniform(k_t, (B,), jnp.float32, 0.1, 1.0)   # time steps in (0, 1]

    out = sn_model_forward(t, x, params)
    out = jax.block_until_ready(out)

    ref = reference_forward(t, x, params)
    # bf16 matmul operands (f32 accumulation) + tanh-approximate GELU
    # (vs the reference's exact erf GELU) => slightly looser tolerances.
    np.testing.assert_allclose(np.asarray(out), np.asarray(ref), rtol=2e-2, atol=8e-3)

    print("KERNEL_OK")
</pallas_src>

<mosaic_0001>
module attributes {stable_mosaic.version = 11 : i64} {
  func.func @sn_model_kernel(%arg0: i32, %arg1: memref<16x1xf32, #tpu.memory_space<vmem>>, %arg2: memref<16x128xf32, #tpu.memory_space<vmem>>, %arg3: memref<1x16xf32, #tpu.memory_space<vmem>>, %arg4: memref<16x32xbf16, #tpu.memory_space<vmem>>, %arg5: memref<16x32xbf16, #tpu.memory_space<vmem>>, %arg6: memref<1x32xf32, #tpu.memory_space<vmem>>, %arg7: memref<32x256xbf16, #tpu.memory_space<vmem>>, %arg8: memref<1x256xf32, #tpu.memory_space<vmem>>, %arg9: memref<128x256xbf16, #tpu.memory_space<vmem>>, %arg10: memref<1x256xf32, #tpu.memory_space<vmem>>, %arg11: memref<256x512xbf16, #tpu.memory_space<vmem>>, %arg12: memref<1x512xf32, #tpu.memory_space<vmem>>, %arg13: memref<512x512xbf16, #tpu.memory_space<vmem>>, %arg14: memref<1x512xf32, #tpu.memory_space<vmem>>, %arg15: memref<512x128xbf16, #tpu.memory_space<vmem>>, %arg16: memref<1x128xf32, #tpu.memory_space<vmem>>, %arg17: memref<16x128xf32, #tpu.memory_space<vmem>>) attributes {dimension_semantics = [#tpu.dimension_semantics<parallel>], iteration_bounds = array<i64: 1>, scalar_prefetch = 0 : i64, scratch_operands = 0 : i64, tpu.core_type = #tpu.core_type<tc>, window_params = [{transform_indices = @transform_0, window_bounds = array<i64: 16, 1>}, {transform_indices = @transform_1, window_bounds = array<i64: 16, 128>}, {pipeline_mode = #tpu.pipeline_mode<synchronous>, transform_indices = @transform_2, window_bounds = array<i64: 1, 16>}, {pipeline_mode = #tpu.pipeline_mode<synchronous>, transform_indices = @transform_3, window_bounds = array<i64: 16, 32>}, {pipeline_mode = #tpu.pipeline_mode<synchronous>, transform_indices = @transform_4, window_bounds = array<i64: 16, 32>}, {pipeline_mode = #tpu.pipeline_mode<synchronous>, transform_indices = @transform_5, window_bounds = array<i64: 1, 32>}, {pipeline_mode = #tpu.pipeline_mode<synchronous>, transform_indices = @transform_6, window_bounds = array<i64: 32, 256>}, {pipeline_mode = #tpu.pipeline_mode<synchronous>, transform_indices = @transform_7, window_bounds = array<i64: 1, 256>}, {pipeline_mode = #tpu.pipeline_mode<synchronous>, transform_indices = @transform_8, window_bounds = array<i64: 128, 256>}, {pipeline_mode = #tpu.pipeline_mode<synchronous>, transform_indices = @transform_9, window_bounds = array<i64: 1, 256>}, {pipeline_mode = #tpu.pipeline_mode<synchronous>, transform_indices = @transform_10, window_bounds = array<i64: 256, 512>}, {pipeline_mode = #tpu.pipeline_mode<synchronous>, transform_indices = @transform_11, window_bounds = array<i64: 1, 512>}, {pipeline_mode = #tpu.pipeline_mode<synchronous>, transform_indices = @transform_12, window_bounds = array<i64: 512, 512>}, {pipeline_mode = #tpu.pipeline_mode<synchronous>, transform_indices = @transform_13, window_bounds = array<i64: 1, 512>}, {pipeline_mode = #tpu.pipeline_mode<synchronous>, transform_indices = @transform_14, window_bounds = array<i64: 512, 128>}, {pipeline_mode = #tpu.pipeline_mode<synchronous>, transform_indices = @transform_15, window_bounds = array<i64: 1, 128>}, {transform_indices = @transform_16, window_bounds = array<i64: 16, 128>}]} {
    %c0 = arith.constant 0 : index
    %c0_0 = arith.constant 0 : index
    %0 = vector.load %arg1[%c0, %c0_0] : memref<16x1xf32, #tpu.memory_space<vmem>>, vector<16x1xf32>
    %c0_1 = arith.constant 0 : index
    %c0_2 = arith.constant 0 : index
    %1 = vector.load %arg3[%c0_1, %c0_2] : memref<1x16xf32, #tpu.memory_space<vmem>>, vector<1x16xf32>
    %2 = vector.broadcast %0 : vector<16x1xf32> to vector<16x16xf32>
    %3 = vector.broadcast %1 : vector<1x16xf32> to vector<16x16xf32>
    %4 = arith.mulf %2, %3 : vector<16x16xf32>
    %5 = math.sin %4 : vector<16x16xf32>
    %6 = arith.truncf %5 : vector<16x16xf32> to vector<16x16xbf16>
    %7 = math.cos %4 : vector<16x16xf32>
    %8 = arith.truncf %7 : vector<16x16xf32> to vector<16x16xbf16>
    %c0_3 = arith.constant 0 : index
    %c0_4 = arith.constant 0 : index
    %9 = vector.load %arg4[%c0_3, %c0_4] : memref<16x32xbf16, #tpu.memory_space<vmem>>, vector<16x32xbf16>
    %cst = arith.constant dense<0.000000e+00> : vector<16x32xf32>
    %10 = tpu.matmul %6, %9, %cst {dimension_numbers = #tpu.dot_dimension_numbers<[1], [0], [0], [1], [0, 0, 1, 1], [], []>} : vector<16x16xbf16>, vector<16x32xbf16>, vector<16x32xf32> -> vector<16x32xf32>
    %c0_5 = arith.constant 0 : index
    %c0_6 = arith.constant 0 : index
    %11 = vector.load %arg5[%c0_5, %c0_6] : memref<16x32xbf16, #tpu.memory_space<vmem>>, vector<16x32xbf16>
    %cst_7 = arith.constant dense<0.000000e+00> : vector<16x32xf32>
    %12 = tpu.matmul %8, %11, %cst_7 {dimension_numbers = #tpu.dot_dimension_numbers<[1], [0], [0], [1], [0, 0, 1, 1], [], []>} : vector<16x16xbf16>, vector<16x32xbf16>, vector<16x32xf32> -> vector<16x32xf32>
    %13 = arith.addf %10, %12 : vector<16x32xf32>
    %c0_8 = arith.constant 0 : index
    %c0_9 = arith.constant 0 : index
    %14 = vector.load %arg6[%c0_8, %c0_9] : memref<1x32xf32, #tpu.memory_space<vmem>>, vector<1x32xf32>
    %15 = vector.broadcast %14 : vector<1x32xf32> to vector<16x32xf32>
    %16 = arith.addf %13, %15 : vector<16x32xf32>
    %17 = arith.negf %16 : vector<16x32xf32>
    %18 = math.exp %17 : vector<16x32xf32>
    %cst_10 = arith.constant 1.000000e+00 : f32
    %19 = vector.broadcast %cst_10 : f32 to vector<16x32xf32>
    %20 = arith.addf %19, %18 : vector<16x32xf32>
    %21 = arith.divf %19, %20 : vector<16x32xf32>
    %22 = arith.mulf %16, %21 : vector<16x32xf32>
    %23 = arith.truncf %22 : vector<16x32xf32> to vector<16x32xbf16>
    %c0_11 = arith.constant 0 : index
    %c0_12 = arith.constant 0 : index
    %24 = vector.load %arg7[%c0_11, %c0_12] : memref<32x256xbf16, #tpu.memory_space<vmem>>, vector<32x256xbf16>
    %cst_13 = arith.constant dense<0.000000e+00> : vector<16x256xf32>
    %25 = tpu.matmul %23, %24, %cst_13 {dimension_numbers = #tpu.dot_dimension_numbers<[1], [0], [0], [1], [0, 0, 1, 1], [], []>} : vector<16x32xbf16>, vector<32x256xbf16>, vector<16x256xf32> -> vector<16x256xf32>
    %c0_14 = arith.constant 0 : index
    %c0_15 = arith.constant 0 : index
    %26 = vector.load %arg8[%c0_14, %c0_15] : memref<1x256xf32, #tpu.memory_space<vmem>>, vector<1x256xf32>
    %27 = vector.broadcast %26 : vector<1x256xf32> to vector<16x256xf32>
    %28 = arith.addf %25, %27 : vector<16x256xf32>
    %c0_16 = arith.constant 0 : index
    %c0_17 = arith.constant 0 : index
    %29 = vector.load %arg2[%c0_16, %c0_17] : memref<16x128xf32, #tpu.memory_space<vmem>>, vector<16x128xf32>
    %30 = arith.truncf %29 : vector<16x128xf32> to vector<16x128xbf16>
    %c0_18 = arith.constant 0 : index
    %c0_19 = arith.constant 0 : index
    %31 = vector.load %arg9[%c0_18, %c0_19] : memref<128x256xbf16, #tpu.memory_space<vmem>>, vector<128x256xbf16>
    %cst_20 = arith.constant dense<0.000000e+00> : vector<16x256xf32>
    %32 = tpu.matmul %30, %31, %cst_20 {dimension_numbers = #tpu.dot_dimension_numbers<[1], [0], [0], [1], [0, 0, 1, 1], [], []>} : vector<16x128xbf16>, vector<128x256xbf16>, vector<16x256xf32> -> vector<16x256xf32>
    %c0_21 = arith.constant 0 : index
    %c0_22 = arith.constant 0 : index
    %33 = vector.load %arg10[%c0_21, %c0_22] : memref<1x256xf32, #tpu.memory_space<vmem>>, vector<1x256xf32>
    %34 = vector.broadcast %33 : vector<1x256xf32> to vector<16x256xf32>
    %35 = arith.addf %32, %34 : vector<16x256xf32>
    %cst_23 = arith.constant 5.000000e-01 : f32
    %36 = vector.broadcast %cst_23 : f32 to vector<16x256xf32>
    %37 = arith.mulf %36, %35 : vector<16x256xf32>
    %38 = arith.mulf %35, %35 : vector<16x256xf32>
    %39 = arith.mulf %38, %35 : vector<16x256xf32>
    %cst_24 = arith.constant 4.471500e-02 : f32
    %40 = vector.broadcast %cst_24 : f32 to vector<16x256xf32>
    %41 = arith.mulf %40, %39 : vector<16x256xf32>
    %42 = arith.addf %35, %41 : vector<16x256xf32>
    %cst_25 = arith.constant 0.797884583 : f32
    %43 = vector.broadcast %cst_25 : f32 to vector<16x256xf32>
    %44 = arith.mulf %43, %42 : vector<16x256xf32>
    %45 = math.tanh %44 : vector<16x256xf32>
    %cst_26 = arith.constant 1.000000e+00 : f32
    %46 = vector.broadcast %cst_26 : f32 to vector<16x256xf32>
    %47 = arith.addf %46, %45 : vector<16x256xf32>
    %48 = arith.mulf %37, %47 : vector<16x256xf32>
    %49 = arith.addf %48, %28 : vector<16x256xf32>
    %50 = arith.truncf %49 : vector<16x256xf32> to vector<16x256xbf16>
    %c0_27 = arith.constant 0 : index
    %c0_28 = arith.constant 0 : index
    %51 = vector.load %arg11[%c0_27, %c0_28] : memref<256x512xbf16, #tpu.memory_space<vmem>>, vector<256x512xbf16>
    %cst_29 = arith.constant dense<0.000000e+00> : vector<16x512xf32>
    %52 = tpu.matmul %50, %51, %cst_29 {dimension_numbers = #tpu.dot_dimension_numbers<[1], [0], [0], [1], [0, 0, 1, 1], [], []>} : vector<16x256xbf16>, vector<256x512xbf16>, vector<16x512xf32> -> vector<16x512xf32>
    %c0_30 = arith.constant 0 : index
    %c0_31 = arith.constant 0 : index
    %53 = vector.load %arg12[%c0_30, %c0_31] : memref<1x512xf32, #tpu.memory_space<vmem>>, vector<1x512xf32>
    %54 = vector.broadcast %53 : vector<1x512xf32> to vector<16x512xf32>
    %55 = arith.addf %52, %54 : vector<16x512xf32>
    %cst_32 = arith.constant 5.000000e-01 : f32
    %56 = vector.broadcast %cst_32 : f32 to vector<16x512xf32>
    %57 = arith.mulf %56, %55 : vector<16x512xf32>
    %58 = arith.mulf %55, %55 : vector<16x512xf32>
    %59 = arith.mulf %58, %55 : vector<16x512xf32>
    %cst_33 = arith.constant 4.471500e-02 : f32
    %60 = vector.broadcast %cst_33 : f32 to vector<16x512xf32>
    %61 = arith.mulf %60, %59 : vector<16x512xf32>
    %62 = arith.addf %55, %61 : vector<16x512xf32>
    %cst_34 = arith.constant 0.797884583 : f32
    %63 = vector.broadcast %cst_34 : f32 to vector<16x512xf32>
    %64 = arith.mulf %63, %62 : vector<16x512xf32>
    %65 = math.tanh %64 : vector<16x512xf32>
    %cst_35 = arith.constant 1.000000e+00 : f32
    %66 = vector.broadcast %cst_35 : f32 to vector<16x512xf32>
    %67 = arith.addf %66, %65 : vector<16x512xf32>
    %68 = arith.mulf %57, %67 : vector<16x512xf32>
    %69 = arith.truncf %68 : vector<16x512xf32> to vector<16x512xbf16>
    %c0_36 = arith.constant 0 : index
    %c0_37 = arith.constant 0 : index
    %70 = vector.load %arg13[%c0_36, %c0_37] : memref<512x512xbf16, #tpu.memory_space<vmem>>, vector<512x512xbf16>
    %cst_38 = arith.constant dense<0.000000e+00> : vector<16x512xf32>
    %71 = tpu.matmul %69, %70, %cst_38 {dimension_numbers = #tpu.dot_dimension_numbers<[1], [0], [0], [1], [0, 0, 1, 1], [], []>} : vector<16x512xbf16>, vector<512x512xbf16>, vector<16x512xf32> -> vector<16x512xf32>
    %c0_39 = arith.constant 0 : index
    %c0_40 = arith.constant 0 : index
    %72 = vector.load %arg14[%c0_39, %c0_40] : memref<1x512xf32, #tpu.memory_space<vmem>>, vector<1x512xf32>
    %73 = vector.broadcast %72 : vector<1x512xf32> to vector<16x512xf32>
    %74 = arith.addf %71, %73 : vector<16x512xf32>
    %cst_41 = arith.constant 5.000000e-01 : f32
    %75 = vector.broadcast %cst_41 : f32 to vector<16x512xf32>
    %76 = arith.mulf %75, %74 : vector<16x512xf32>
    %77 = arith.mulf %74, %74 : vector<16x512xf32>
    %78 = arith.mulf %77, %74 : vector<16x512xf32>
    %cst_42 = arith.constant 4.471500e-02 : f32
    %79 = vector.broadcast %cst_42 : f32 to vector<16x512xf32>
    %80 = arith.mulf %79, %78 : vector<16x512xf32>
    %81 = arith.addf %74, %80 : vector<16x512xf32>
    %cst_43 = arith.constant 0.797884583 : f32
    %82 = vector.broadcast %cst_43 : f32 to vector<16x512xf32>
    %83 = arith.mulf %82, %81 : vector<16x512xf32>
    %84 = math.tanh %83 : vector<16x512xf32>
    %cst_44 = arith.constant 1.000000e+00 : f32
    %85 = vector.broadcast %cst_44 : f32 to vector<16x512xf32>
    %86 = arith.addf %85, %84 : vector<16x512xf32>
    %87 = arith.mulf %76, %86 : vector<16x512xf32>
    %88 = arith.truncf %87 : vector<16x512xf32> to vector<16x512xbf16>
    %c0_45 = arith.constant 0 : index
    %c0_46 = arith.constant 0 : index
    %89 = vector.load %arg15[%c0_45, %c0_46] : memref<512x128xbf16, #tpu.memory_space<vmem>>, vector<512x128xbf16>
    %cst_47 = arith.constant dense<0.000000e+00> : vector<16x128xf32>
    %90 = tpu.matmul %88, %89, %cst_47 {dimension_numbers = #tpu.dot_dimension_numbers<[1], [0], [0], [1], [0, 0, 1, 1], [], []>} : vector<16x512xbf16>, vector<512x128xbf16>, vector<16x128xf32> -> vector<16x128xf32>
    %c0_48 = arith.constant 0 : index
    %c0_49 = arith.constant 0 : index
    %91 = vector.load %arg16[%c0_48, %c0_49] : memref<1x128xf32, #tpu.memory_space<vmem>>, vector<1x128xf32>
    %92 = vector.broadcast %91 : vector<1x128xf32> to vector<16x128xf32>
    %93 = arith.addf %90, %92 : vector<16x128xf32>
    %cst_50 = arith.constant 6.43775177 : f32
    %94 = vector.broadcast %cst_50 : f32 to vector<16x1xf32>
    %95 = arith.mulf %94, %0 : vector<16x1xf32>
    %96 = math.exp %95 : vector<16x1xf32>
    %cst_51 = arith.constant 1.000000e+00 : f32
    %97 = vector.broadcast %cst_51 : f32 to vector<16x1xf32>
    %98 = arith.subf %96, %97 : vector<16x1xf32>
    %cst_52 = arith.constant 0.155333728 : f32
    %99 = vector.broadcast %cst_52 : f32 to vector<16x1xf32>
    %100 = arith.mulf %98, %99 : vector<16x1xf32>
    %101 = math.rsqrt %100 : vector<16x1xf32>
    %102 = vector.broadcast %101 : vector<16x1xf32> to vector<16x128xf32>
    %103 = arith.mulf %93, %102 : vector<16x128xf32>
    %c0_53 = arith.constant 0 : index
    %c0_54 = arith.constant 0 : index
    %104 = vector.load %arg17[%c0_53, %c0_54] : memref<16x128xf32, #tpu.memory_space<vmem>>, vector<16x128xf32>
    tpu.vector_store %arg17[%c0_53, %c0_54], %103 {strides = array<i32>} : memref<16x128xf32, #tpu.memory_space<vmem>>, vector<16x128xf32>,
    return
  }
  func.func @transform_0(%arg0: i32) -> (i32, i32) {
    %c0_i32 = arith.constant 0 : i32
    %c0_i32_0 = arith.constant 0 : i32
    return %arg0, %c0_i32 : i32, i32
  }
  func.func @transform_1(%arg0: i32) -> (i32, i32) {
    %c0_i32 = arith.constant 0 : i32
    %c0_i32_0 = arith.constant 0 : i32
    return %arg0, %c0_i32 : i32, i32
  }
  func.func @transform_2(%arg0: i32) -> (i32, i32) {
    %c0_i32 = arith.constant 0 : i32
    %c0_i32_0 = arith.constant 0 : i32
    %c0_i32_1 = arith.constant 0 : i32
    return %c0_i32, %c0_i32_0 : i32, i32
  }
  func.func @transform_3(%arg0: i32) -> (i32, i32) {
    %c0_i32 = arith.constant 0 : i32
    %c0_i32_0 = arith.constant 0 : i32
    %c0_i32_1 = arith.constant 0 : i32
    return %c0_i32, %c0_i32_0 : i32, i32
  }
  func.func @transform_4(%arg0: i32) -> (i32, i32) {
    %c0_i32 = arith.constant 0 : i32
    %c0_i32_0 = arith.constant 0 : i32
    %c0_i32_1 = arith.constant 0 : i32
    return %c0_i32, %c0_i32_0 : i32, i32
  }
  func.func @transform_5(%arg0: i32) -> (i32, i32) {
    %c0_i32 = arith.constant 0 : i32
    %c0_i32_0 = arith.constant 0 : i32
    %c0_i32_1 = arith.constant 0 : i32
    return %c0_i32, %c0_i32_0 : i32, i32
  }
  func.func @transform_6(%arg0: i32) -> (i32, i32) {
    %c0_i32 = arith.constant 0 : i32
    %c0_i32_0 = arith.constant 0 : i32
    %c0_i32_1 = arith.constant 0 : i32
    return %c0_i32, %c0_i32_0 : i32, i32
  }
  func.func @transform_7(%arg0: i32) -> (i32, i32) {
    %c0_i32 = arith.constant 0 : i32
    %c0_i32_0 = arith.constant 0 : i32
    %c0_i32_1 = arith.constant 0 : i32
    return %c0_i32, %c0_i32_0 : i32, i32
  }
  func.func @transform_8(%arg0: i32) -> (i32, i32) {
    %c0_i32 = arith.constant 0 : i32
    %c0_i32_0 = arith.constant 0 : i32
    %c0_i32_1 = arith.constant 0 : i32
    return %c0_i32, %c0_i32_0 : i32, i32
  }
  func.func @transform_9(%arg0: i32) -> (i32, i32) {
    %c0_i32 = arith.constant 0 : i32
    %c0_i32_0 = arith.constant 0 : i32
    %c0_i32_1 = arith.constant 0 : i32
    return %c0_i32, %c0_i32_0 : i32, i32
  }
  func.func @transform_10(%arg0: i32) -> (i32, i32) {
    %c0_i32 = arith.constant 0 : i32
    %c0_i32_0 = arith.constant 0 : i32
    %c0_i32_1 = arith.constant 0 : i32
    return %c0_i32, %c0_i32_0 : i32, i32
  }
  func.func @transform_11(%arg0: i32) -> (i32, i32) {
    %c0_i32 = arith.constant 0 : i32
    %c0_i32_0 = arith.constant 0 : i32
    %c0_i32_1 = arith.constant 0 : i32
    return %c0_i32, %c0_i32_0 : i32, i32
  }
  func.func @transform_12(%arg0: i32) -> (i32, i32) {
    %c0_i32 = arith.constant 0 : i32
    %c0_i32_0 = arith.constant 0 : i32
    %c0_i32_1 = arith.constant 0 : i32
    return %c0_i32, %c0_i32_0 : i32, i32
  }
  func.func @transform_13(%arg0: i32) -> (i32, i32) {
    %c0_i32 = arith.constant 0 : i32
    %c0_i32_0 = arith.constant 0 : i32
    %c0_i32_1 = arith.constant 0 : i32
    return %c0_i32, %c0_i32_0 : i32, i32
  }
  func.func @transform_14(%arg0: i32) -> (i32, i32) {
    %c0_i32 = arith.constant 0 : i32
    %c0_i32_0 = arith.constant 0 : i32
    %c0_i32_1 = arith.constant 0 : i32
    return %c0_i32, %c0_i32_0 : i32, i32
  }
  func.func @transform_15(%arg0: i32) -> (i32, i32) {
    %c0_i32 = arith.constant 0 : i32
    %c0_i32_0 = arith.constant 0 : i32
    %c0_i32_1 = arith.constant 0 : i32
    return %c0_i32, %c0_i32_0 : i32, i32
  }
  func.func @transform_16(%arg0: i32) -> (i32, i32) {
    %c0_i32 = arith.constant 0 : i32
    %c0_i32_0 = arith.constant 0 : i32
    return %arg0, %c0_i32 : i32, i32
  }
}

</mosaic_0001>

<bundles_post_ra>
// kernel: tpu_custom_call.1
= control target key start
LH: loop header
LB: loop body
LE: loop exit
PB: predicated region body
PF: predicated region fallthrough
CT: control target
= control target key end

     0   :  { %s4513_s0 = inlined_call_operand.vmem [shape: f32[16,1], index: 0, kind: input, shape index: {}]   ;;  %s4514_s1 = inlined_call_operand.hbm [shape: f32[16,128], index: 1, kind: input, shape index: {}]   ;;  %s4515_s2 = inlined_call_operand.vmem [shape: f32[1,16], index: 2, kind: input, shape index: {}]   ;;  %s4516_s3 = inlined_call_operand.hbm [shape: bf16[16,32], index: 3, kind: input, shape index: {}]   ;;  %s4517_s4 = inlined_call_operand.hbm [shape: bf16[16,32], index: 4, kind: input, shape index: {}]   ;;  %s4518_s5 = inlined_call_operand.hbm [shape: f32[1,32], index: 5, kind: input, shape index: {}]   ;;  %s4519_s6 = inlined_call_operand.vmem [shape: bf16[32,256], index: 6, kind: input, shape index: {}]   ;;  %s4520_s7 = inlined_call_operand.vmem [shape: f32[1,256], index: 7, kind: input, shape index: {}]   ;;  %s4521_s8 = inlined_call_operand.hbm [shape: bf16[128,256], index: 8, kind: input, shape index: {}]   ;;  %s4522_s9 = inlined_call_operand.vmem [shape: f32[1,256], index: 9, kind: input, shape index: {}]   ;;  %s4523_s10 = inlined_call_operand.hbm [shape: bf16[256,512], index: 10, kind: input, shape index: {}]   ;;  %s4524_s11 = inlined_call_operand.vmem [shape: f32[1,512], index: 11, kind: input, shape index: {}]   ;;  %s4525_s12 = inlined_call_operand.hbm [shape: bf16[512,512], index: 12, kind: input, shape index: {}]   ;;  %s4526_s13 = inlined_call_operand.vmem [shape: f32[1,512], index: 13, kind: input, shape index: {}]   ;;  %s4527_s14 = inlined_call_operand.hbm [shape: bf16[512,128], index: 14, kind: input, shape index: {}]   ;;  %s4528_s15 = inlined_call_operand.vmem [shape: f32[1,128], index: 15, kind: input, shape index: {}]   ;;  %s4529_s16 = inlined_call_operand.hbm [shape: f32[16,128], index: 16, kind: output, shape index: {}]  }
   0x1   :  { %4533 = sst [smem:[#allocation23_spill]] %s4513_s0 }
   0x2   :  { %4534 = sst [smem:[#allocation24_spill]] %s4529_s16 }
   0x3   :  { %21 = vsyncpa [#allocation3], 0 }
   0x4   :  { %22 = vsyncpa [#allocation6], 0 }
   0x5   :  { %23 = vsyncpa [#allocation9], 0 }
   0x6   :  { %24 = vsyncpa [#allocation12], 0 }
   0x7   :  { %25 = vsyncpa [#allocation15], 0 }
   0x8   :  { %26 = vsyncpa [#allocation4], 0  ;;  %s4013_s21 = smov [#allocation5]   ;;  %s3803_s25 = scalar_lea.hbm %s4516_s3, 128 }
   0x9   :  { %s48_s22 = sshll.u32 %s4013_s21, 4  ;;  %p3804_p0 = scmp.ne.s32.totalorder %s4516_s3, %s3803_s25  ;;  %s49_s22 = int_to_ptr.vmem [resolvable:$true] %s48_s22 }
   0xa   :  { %p3807_p1 = scmp.lt.u32.totalorder %s3803_s25, %s4516_s3 }
   0xc   :  { %p3809_p2 = pnand %p3807_p1, %p3804_p0 }
   0xe   :  { %3812 = shalt.err (!%p3809_p2)
}
   0xf   :  { %s3813_s30 = scalar_lea.vmem %s49_s22, 128  ;;  %p3818_p4 = scmp.lt.s32.totalorder %s49_s22, %s49_s22 }
  0x10   :  { %p3814_p3 = scmp.ne.s32.totalorder %s49_s22, %s3813_s30  ;;  %p3819_p5 = scmp.lt.s32.totalorder %s3813_s30, %s3813_s30 }
  0x12   :  { %p3820_p6 = por %p3819_p5, %p3818_p4 }
  0x14   :  { %p3821_p7 = pnand %p3820_p6, %p3814_p3 }
  0x16   :  { %3824 = shalt.err (!%p3821_p7)
}
  0x17   :  { %s4014_s0 = smov 64   ;;  %s4015_s17 = smov 4  }
  0x18   :  { %54 = dma.hbm_to_vmem [thread:$0]  %s4516_s3, 128, %s49_s22, [#allocation6], %s4014_s0, %s4014_s0, %s4015_s17  }
  0x19   :  { %s4016_s20 = smov [#allocation8]   ;;  %s4017_s23 = smov [#allocation11]  }
  0x1a   :  { %s73_s21 = sshll.u32 %s4016_s20, 4  ;;  %s100_s24 = sshll.u32 %s4017_s23, 4  ;;  %s74_s21 = int_to_ptr.vmem [resolvable:$true] %s73_s21  ;;  %s101_s24 = int_to_ptr.vmem [resolvable:$true] %s100_s24 }
  0x1b   :  { %s3825_s27 = scalar_lea.hbm %s4518_s5, 16 }
  0x1c   :  { %p3826_p8 = scmp.ne.s32.totalorder %s4518_s5, %s3825_s27  ;;  %p3829_p9 = scmp.lt.u32.totalorder %s3825_s27, %s4518_s5 }
  0x1e   :  { %p3831_p10 = pnand %p3829_p9, %p3826_p8 }
  0x20   :  { %3834 = shalt.err (!%p3831_p10)
}
  0x21   :  { %s3835_s3 = scalar_lea.vmem %s74_s21, 16  ;;  %s3839_s22 = scalar_lea.vmem %s74_s21, 32 }
  0x22   :  { %p3836_p11 = scmp.ne.s32.totalorder %s74_s21, %s3835_s3  ;;  %p3840_p12 = scmp.lt.s32.totalorder %s74_s21, %s74_s21 }
  0x23   :  { %p3841_p13 = scmp.lt.s32.totalorder %s3839_s22, %s3835_s3 }
  0x25   :  { %p3842_p0 = por %p3841_p13, %p3840_p12 }
  0x27   :  { %p3843_p1 = pnand %p3842_p0, %p3836_p11 }
  0x29   :  { %3846 = shalt.err (!%p3843_p1)
}
  0x2a   :  { %76 = dma.hbm_to_vmem [thread:$0]  %s4518_s5, 16, %s74_s21, [#allocation9]  }
  0x2b   :  { %s3847_s16 = scalar_lea.hbm %s4523_s10, 8192 }
  0x2c   :  { %p3848_p2 = scmp.ne.s32.totalorder %s4523_s10, %s3847_s16  ;;  %p3851_p3 = scmp.lt.u32.totalorder %s3847_s16, %s4523_s10 }
  0x2e   :  { %p3853_p4 = pnand %p3851_p3, %p3848_p2 }
  0x30   :  { %3856 = shalt.err (!%p3853_p4)
}
  0x31   :  { %s3857_s29 = scalar_lea.vmem %s101_s24, 8192  ;;  %p3862_p6 = scmp.lt.s32.totalorder %s101_s24, %s101_s24 }
  0x32   :  { %p3858_p5 = scmp.ne.s32.totalorder %s101_s24, %s3857_s29  ;;  %p3863_p7 = scmp.lt.s32.totalorder %s3857_s29, %s3857_s29 }
  0x34   :  { %p3864_p8 = por %p3863_p7, %p3862_p6 }
  0x36   :  { %p3865_p9 = pnand %p3864_p8, %p3858_p5 }
  0x38   :  { %3868 = shalt.err (!%p3865_p9)
}
  0x39   :  { %s4532_s5 = smov 256   ;;  %s4019_s21 = smov 16  }
  0x3a   :  { %106 = dma.hbm_to_vmem [thread:$0]  %s4523_s10, 8192, %s101_s24, [#allocation12], %s4532_s5, %s4532_s5, %s4019_s21  }
  0x3b   :  { %s4020_s22 = smov [#allocation2]   ;;  %s3869_s23 = scalar_lea.hbm %s4514_s1, 256 }
  0x3c   :  { %s34_s18 = sshll.u32 %s4020_s22, 4  ;;  %p3870_p10 = scmp.ne.s32.totalorder %s4514_s1, %s3869_s23  ;;  %s35_s18 = int_to_ptr.vmem [resolvable:$true] %s34_s18 }
  0x3d   :  { %p3873_p11 = scmp.lt.u32.totalorder %s3869_s23, %s4514_s1 }
  0x3f   :  { %p3875_p12 = pnand %p3873_p11, %p3870_p10 }
  0x41   :  { %3878 = shalt.err (!%p3875_p12)
}
  0x42   :  { %s3879_s28 = scalar_lea.vmem %s35_s18, 256  ;;  %p3884_p0 = scmp.lt.s32.totalorder %s35_s18, %s35_s18 }
  0x43   :  { %p3880_p13 = scmp.ne.s32.totalorder %s35_s18, %s3879_s28  ;;  %p3885_p1 = scmp.lt.s32.totalorder %s3879_s28, %s3879_s28 }
  0x45   :  { %p3886_p2 = por %p3885_p1, %p3884_p0 }
  0x47   :  { %p3887_p3 = pnand %p3886_p2, %p3880_p13 }
  0x49   :  { %3890 = shalt.err (!%p3887_p3)
}
  0x4a   :  { %s4021_s10 = smov 128   ;;  %s4022_s24 = smov 8  }
  0x4b   :  { %40 = dma.hbm_to_vmem [thread:$0]  %s4514_s1, 256, %s35_s18, [#allocation3], %s4021_s10, %s4021_s10, %s4022_s24  }
  0x4c   :  { %s4023_s3 = smov [#allocation7]   ;;  %s4024_s19 = smov [#allocation10]  }
  0x4d   :  { %s60_s22 = sshll.u32 %s4023_s3, 4  ;;  %s86_s20 = sshll.u32 %s4024_s19, 4  ;;  %s61_s22 = int_to_ptr.vmem [resolvable:$true] %s60_s22  ;;  %s4179_s20 = int_to_ptr.vmem [resolvable:$true] %s86_s20 }
  0x4e   :  { %s3891_s25 = scalar_lea.hbm %s4517_s4, 128 }
  0x4f   :  { %p3892_p4 = scmp.ne.s32.totalorder %s4517_s4, %s3891_s25  ;;  %p3895_p5 = scmp.lt.u32.totalorder %s3891_s25, %s4517_s4 }
  0x51   :  { %p3897_p6 = pnand %p3895_p5, %p3892_p4 }
  0x53   :  { %3900 = shalt.err (!%p3897_p6)
}
  0x54   :  { %s3901_s1 = scalar_lea.vmem %s61_s22, 128  ;;  %p3906_p8 = scmp.lt.s32.totalorder %s61_s22, %s61_s22 }
  0x55   :  { %p3902_p7 = scmp.ne.s32.totalorder %s61_s22, %s3901_s1  ;;  %p3907_p9 = scmp.lt.s32.totalorder %s3901_s1, %s3901_s1 }
  0x57   :  { %p3908_p10 = por %p3907_p9, %p3906_p8 }
  0x59   :  { %p3909_p11 = pnand %p3908_p10, %p3902_p7 }
  0x5b   :  { %3912 = shalt.err (!%p3909_p11)
}
  0x5c   :  { %66 = dma.hbm_to_vmem [thread:$0]  %s4517_s4, 128, %s61_s22, [#allocation6], %s4014_s0, %s4014_s0, %s4015_s17  }
  0x5d   :  { %s3913_s5 = scalar_lea.hbm %s4521_s8, 2048 }
  0x5e   :  { %p3914_p12 = scmp.ne.s32.totalorder %s4521_s8, %s3913_s5  ;;  %p3917_p13 = scmp.lt.u32.totalorder %s3913_s5, %s4521_s8 }
  0x60   :  { %p3919_p0 = pnand %p3917_p13, %p3914_p12 }
  0x62   :  { %3922 = shalt.err (!%p3919_p0)
}
  0x63   :  { %s3923_s26 = scalar_lea.vmem %s4179_s20, 2048  ;;  %p3928_p2 = scmp.lt.s32.totalorder %s4179_s20, %s4179_s20 }
  0x64   :  { %p3924_p1 = scmp.ne.s32.totalorder %s4179_s20, %s3923_s26  ;;  %p3929_p3 = scmp.lt.s32.totalorder %s3923_s26, %s3923_s26 }
  0x66   :  { %p3930_p4 = por %p3929_p3, %p3928_p2 }
  0x68   :  { %p3931_p5 = pnand %p3930_p4, %p3924_p1 }
  0x6a   :  { %3934 = shalt.err (!%p3931_p5)
}
  0x6b   :  { %92 = dma.hbm_to_vmem [thread:$0]  %s4521_s8, 2048, %s4179_s20, [#allocation9], %s4021_s10, %s4021_s10, %s4022_s24  }
  0x6c   :  { %s4025_s27 = smov [#allocation13]   ;;  %s4026_s1 = smov [#allocation14]  }
  0x6d   :  { %s114_s28 = sshll.u32 %s4025_s27, 4  ;;  %s128_s18 = sshll.u32 %s4026_s1, 4  ;;  %s115_s28 = int_to_ptr.vmem [resolvable:$true] %s114_s28  ;;  %s4216_s18 = int_to_ptr.vmem [resolvable:$true] %s128_s18 }
  0x6e   :  { %s3935_s3 = scalar_lea.hbm %s4525_s12, 16384 }
  0x6f   :  { %p3936_p6 = scmp.ne.s32.totalorder %s4525_s12, %s3935_s3  ;;  %p3939_p7 = scmp.lt.u32.totalorder %s3935_s3, %s4525_s12 }
  0x71   :  { %p3941_p8 = pnand %p3939_p7, %p3936_p6 }
  0x73   :  { %3944 = shalt.err (!%p3941_p8)
}
  0x74   :  { %s3945_s8 = scalar_lea.vmem %s115_s28, 16384  ;;  %p3950_p10 = scmp.lt.s32.totalorder %s115_s28, %s115_s28 }
  0x75   :  { %p3946_p9 = scmp.ne.s32.totalorder %s115_s28, %s3945_s8  ;;  %p3951_p11 = scmp.lt.s32.totalorder %s3945_s8, %s3945_s8 }
  0x77   :  { %p3952_p12 = por %p3951_p11, %p3950_p10 }
  0x79   :  { %p3953_p13 = pnand %p3952_p12, %p3946_p9 }
  0x7b   :  { %3956 = shalt.err (!%p3953_p13)
}
  0x7c   :  { %s4535_s20 = smov 256   ;;  %s3957_s27 = scalar_lea.hbm %s4527_s14, 4096 }
  0x7d   :  { %120 = dma.hbm_to_vmem [thread:$0]  %s4525_s12, 16384, %s115_s28, [#allocation12], %s4535_s20, %s4535_s20, %s4019_s21  }
  0x7e   :  { %p3958_p0 = scmp.ne.s32.totalorder %s4527_s14, %s3957_s27  ;;  %p3961_p1 = scmp.lt.u32.totalorder %s3957_s27, %s4527_s14 }
  0x80   :  { %p3963_p2 = pnand %p3961_p1, %p3958_p0 }
  0x82   :  { %3966 = shalt.err (!%p3963_p2)
}
  0x83   :  { %s3967_s5 = scalar_lea.vmem %s4216_s18, 4096  ;;  %p3972_p4 = scmp.lt.s32.totalorder %s4216_s18, %s4216_s18 }
  0x84   :  { %p3968_p3 = scmp.ne.s32.totalorder %s4216_s18, %s3967_s5  ;;  %p3973_p5 = scmp.lt.s32.totalorder %s3967_s5, %s3967_s5 }
  0x86   :  { %p3974_p6 = por %p3973_p5, %p3972_p4 }
  0x88   :  { %p3975_p7 = pnand %p3974_p6, %p3968_p3 }
  0x8a   :  { %3978 = shalt.err (!%p3975_p7)
}
  0x8b   :  { %134 = dma.hbm_to_vmem [thread:$0]  %s4527_s14, 4096, %s4216_s18, [#allocation15], %s4014_s0, %s4014_s0, %s4015_s17  }
  0x8c   :  { %4001 = dma.done.wait [#allocation3], 256  }
  0x8d   :  { %4002 = vsyncadd [#allocation3], 4294967040 }
  0x8e   :  { %4003 = dma.done.wait [#allocation6], 256  }
  0x8f   :  { %4004 = vsyncadd [#allocation6], 4294967040 }
  0x90   :  { %4005 = dma.done.wait [#allocation9], 2064  }
  0x91   :  { %4006 = vsyncadd [#allocation9], 4294965232 }
  0x92   :  { %4007 = dma.done.wait [#allocation12], 24576  }
  0x93   :  { %4008 = vsyncadd [#allocation12], 4294942720 }
  0x94   :  { %4009 = dma.done.wait [#allocation15], 4096  }
  0x95   :  { %4010 = vsyncadd [#allocation15], 4294963200  ;;  %v4027_v0 = vmov 0   ;;  %s4536_s14 = sld [smem:[#allocation23_spill]]  ;;  %v3387_v15 = vld [vmem:[#allocation7] sm:$0xff]   ;;  %v4028_v16 = vmov 0.0  }
  0x96   :  { %3385 = vset.pattern.permute.xlu0 %v4027_v0  ;;  %954 = vmatprep.mubr.bf16.mxu1 %v4027_v0  ;;  %vm4029_vm0 = vmmov 0   ;;  %v3389_v17 = vld [vmem:[#allocation10 + $0x4] ss:$8 sps:$4 sm:$0xff]   ;;  %v3391_v18 = vld [vmem:[#allocation10] ss:$8 sps:$4 sm:$0xff]   ;;  %s4036_s5 = smov [#allocation16]  }
  0x97   :  { %3386 = vset.pattern.permute.xlu1 %v4027_v0  ;;  %3325 = vmatprep.subr.bf16.mxu0 %v4028_v16  ;;  %v3392_v19 = vld [vmem:[#allocation10 + $0x14] ss:$8 sps:$4 sm:$0xff]   ;;  %v3394_v20 = vld [vmem:[#allocation10 + $0x10] ss:$8 sps:$4 sm:$0xff]   ;;  %v3395_v21 = vld [vmem:[#allocation10 + $0x24] ss:$8 sps:$4 sm:$0xff]  }
  0x98   :  { %3327 = vmatprep.mubr.msk.bf16.mxu0 %vm4029_vm0, %v4028_v16  ;;  %3326 = vmatpush3.bf16.msra.mxu0 %v3387_v15  ;;  %v3397_v22 = vld [vmem:[#allocation10 + $0x20] ss:$8 sps:$4 sm:$0xff]   ;;  %v3398_v23 = vld [vmem:[#allocation10 + $0x34] ss:$8 sps:$4 sm:$0xff]   ;;  %v3400_v24 = vld [vmem:[#allocation10 + $0x30] ss:$8 sps:$4 sm:$0xff]  }
  0x99   :  { %3331 = vmatprep.subr.bf16.mxu0 %v4028_v16  ;;  %922 = vmatprep.subr.bf16.mxu1 %v3389_v17  ;;  %v3401_v25 = vld [vmem:[#allocation10 + $0x44] ss:$8 sps:$4 sm:$0xff]   ;;  %v3403_v26 = vld [vmem:[#allocation10 + $0x40] ss:$8 sps:$4 sm:$0xff]   ;;  %v3404_v27 = vld [vmem:[#allocation10 + $0x54] ss:$8 sps:$4 sm:$0xff]  }
  0x9a   :  { %923 = vmatpush1.bf16.msra.mxu1 %v3391_v18  ;;  %v3406_v28 = vld [vmem:[#allocation10 + $0x50] ss:$8 sps:$4 sm:$0xff]   ;;  %v3005_v29 = vld [vmem:[%s4515_s2] ss:$0 sm:$0xff]  ;;  %v3409_v33 = vld [vmem:[#allocation10 + $0x60] ss:$8 sps:$4 sm:$0xff]  }
  0x9b   :  { %v162_v1 = vld [vmem:[%s4536_s14] sm:$0xff]  ;;  %v163_v2 = vld [vmem:[%s4536_s14 + $0x8] sm:$0xff]  ;;  %924 = vmatprep.subr.bf16.mxu1 %v3392_v19  ;;  %v811_v41 = vld [vmem:[#allocation2] sm:$0xff]  ;;  %v4030_v57 = vmov 683565275   ;;  %s2989_s12 = sshll.u32 %s4036_s5, 4  ;;  %s2990_s12 = int_to_ptr.vmem [resolvable:$true] %s2989_s12 }
  0x9c   :  { %167 = vperm.xlu0 %3385, %v162_v1   ;;  %v2958_v3 = vmul.f32 6.437752, %v162_v1  ;;  %v2959_v4 = vmul.f32 6.437752, %v163_v2  ;;  %v3407_v30 = vld [vmem:[#allocation10 + $0x64] ss:$8 sps:$4 sm:$0xff]   ;;  %p3984_p9 = scmp.lt.s32.totalorder %s2990_s12, %s2990_s12 }
  0x9d   :  { %v3410_v34 = vld [vmem:[#allocation10 + $0x74] ss:$8 sps:$4 sm:$0xff]   ;;  %v3412_v40 = vld [vmem:[#allocation10 + $0x70] ss:$8 sps:$4 sm:$0xff]   ;;  %v812_v42 = vld [vmem:[#allocation2 + $0x8] sm:$0xff] }
  0x9e   :  { %v2960_v5 = vmul.f32 1.442695, %v2958_v3  ;;  %v2962_v6 = vmul.f32 1.442695, %v2959_v4  ;;  %925 = vmatpush1.bf16.msra.mxu1 %v3394_v20  ;;  %v813_v46 = vpack.c.bf16 %v812_v42, %v811_v41  ;;  %v4031_v61 = vmov 2475754826  }
  0x9f   :  { %926 = vmatprep.subr.bf16.mxu1 %v3395_v21  ;;  %v4032_v63 = vmov 2131351028   ;;  %v4034_v4 = vmov 920167782  }
  0xa0   :  { %3739 = vpow2.f32 %v2960_v5  ;;  %172 = vperm.xlu0 %3385, %v163_v2   ;;  %v4033_v2 = vmov 2102212464  }
  0xa1   :  { %3741 = vpow2.f32 %v2962_v6 }
  0xa2   :  { %927 = vmatpush1.bf16.msra.mxu1 %v3397_v22 }
  0xa3   :  { %928 = vmatprep.subr.bf16.mxu1 %v3398_v23 }
  0xa6   :  { %929 = vmatpush1.bf16.msra.mxu1 %v3400_v24 }
  0xa7   :  { %930 = vmatprep.subr.bf16.mxu1 %v3401_v25 }
  0xaa   :  { %v3740_v7 = vpop.eup %3739  ;;  %931 = vmatpush1.bf16.msra.mxu1 %v3403_v26 }
  0xab   :  { %v3742_v8 = vpop.eup %3741  ;;  %v3275_v9 = vadd.f32 -1.0, %v3740_v7  ;;  %932 = vmatprep.subr.bf16.mxu1 %v3404_v27 }
  0xac   :  { %v3276_v10 = vadd.f32 -1.0, %v3742_v8 }
  0xad   :  { %v2966_v11 = vmul.f32 0.15533373, %v3275_v9 }
  0xae   :  { %v2967_v12 = vmul.f32 0.15533373, %v3276_v10  ;;  %933 = vmatpush1.bf16.msra.mxu1 %v3406_v28 }
  0xaf   :  { %3743 = vrsqrt.f32 %v2966_v11  ;;  %934 = vmatprep.subr.bf16.mxu1 %v3407_v30  ;;  %v4035_v11 = vmov 1326507024  }
  0xb0   :  { %3745 = vrsqrt.f32 %v2967_v12 }
  0xb2   :  { %935 = vmatpush1.bf16.msra.mxu1 %v3409_v33 }
  0xb3   :  { %936 = vmatprep.subr.bf16.mxu1 %v3410_v34 }
  0xb6   :  { %937 = vmatpush1.bf16.msra.mxu1 %v3412_v40 }
  0xb9   :  { %v3744_v13 = vpop.eup %3743  ;;  %955 = vmatmul.mubr.bf16.vlgmr.msra.gmra.mrb[0].mxu1 %v813_v46 }
  0xba   :  { %2972 = vperm.xlu1 %3386, %v3744_v13   ;;  %v3746_v14 = vpop.eup %3745 }
  0xbe   :  { %2977 = vperm.xlu1 %3386, %v3746_v14  }
 0x11b   :  { %v168_v31 = vpop.permute.xlu0 %167 }
 0x11c   :  { %v4269_v32 = vmul.f32 %v3005_v29, %v168_v31 }
 0x11e   :  { %v183_v35 = vand.u32 2147483647, %v4269_v32  ;;  %v186_v36 = vand.u32 2139095040, %v4269_v32  ;;  %vm185_vm15 = vcmp.lt.s32.totalorder %v4269_v32, 0 }
 0x11f   :  { %v173_v37 = vpop.permute.xlu0 %172 }
 0x120   :  { %v187_v38 = vshrl.u32 %v186_v36, 23  ;;  %v4273_v39 = vmul.f32 %v3005_v29, %v173_v37  ;;  %v190_v43 = vand.u32 8388607, %v183_v35 }
 0x122   :  { %v3006_v44 = vadd.s32 4294967169, %v187_v38  ;;  %v290_v45 = vand.u32 2139095040, %v4273_v39  ;;  %v191_v48 = vor.u32 8388608, %v190_v43  ;;  %v287_v50 = vand.u32 2147483647, %v4273_v39 }
 0x124   :  { %v193_v47 = vadd.s32 1, %v3006_v44  ;;  %v291_v49 = vshrl.u32 %v290_v45, 23  ;;  %v4279_v55 = vshll.u32 %v191_v48, 8  ;;  %v294_v59 = vand.u32 8388607, %v287_v50 }
 0x126   :  { %vm194_vm1 = vcmp.gt.s32.totalorder %v193_v47, 0  ;;  %v3010_v52 = vadd.s32 4294967169, %v291_v49  ;;  %v295_v27 = vor.u32 8388608, %v294_v59 }
 0x127   :  { %v195_v51 = vsel %vm194_vm1, %v193_v47, 0  ;;  %vm4327_vm1 = vcmp.le.f32.partialorder %v183_v35, 0.7853982 }
 0x128   :  { %v196_v53 = vshrl.u32 %v195_v51, 5  ;;  %v197_v54 = vand.u32 31, %v195_v51  ;;  %v297_v60 = vadd.s32 1, %v3010_v52  ;;  %v335_v43 = vshll.u32 %v295_v27, 8 }
 0x12a   :  { %v198_v56 = vsub.s32 32, %v197_v54  ;;  %v200_v58 = vshll.u32 %v4030_v57, %v197_v54  ;;  %v203_v62 = vshll.u32 %v4031_v61, %v197_v54  ;;  %v206_v1 = vshll.u32 %v4032_v63, %v197_v54 }
 0x12b   :  { %v209_v3 = vshll.u32 %v4033_v2, %v197_v54  ;;  %v212_v5 = vshll.u32 %v4034_v4, %v197_v54  ;;  %vm215_vm2 = vcmp.lt.s32.totalorder %v196_v53, 1  ;;  %vm217_vm3 = vcmp.lt.s32.totalorder %v196_v53, 3 }
 0x12c   :  { %v201_v6 = vshrl.u32 %v4031_v61, %v198_v56  ;;  %v204_v7 = vshrl.u32 %v4032_v63, %v198_v56  ;;  %v207_v8 = vshrl.u32 %v4033_v2, %v198_v56  ;;  %v199_v9 = vshrl.u32 %v4030_v57, %v198_v56 }
 0x12d   :  { %v210_v10 = vshrl.u32 %v4034_v4, %v198_v56  ;;  %v213_v12 = vshrl.u32 %v4035_v11, %v198_v56  ;;  %vm298_vm4 = vcmp.gt.s32.totalorder %v297_v60, 0  ;;  %vm218_vm5 = vcmp.lt.s32.totalorder %v196_v53, 4 }
 0x12e   :  { %v202_v13 = vor.u32 %v201_v6, %v200_v58  ;;  %v205_v14 = vor.u32 %v204_v7, %v203_v62  ;;  %v208_v15 = vor.u32 %v207_v8, %v206_v1  ;;  %v299_v19 = vsel %vm298_vm4, %v297_v60, 0 }
 0x12f   :  { %v211_v17 = vor.u32 %v210_v10, %v209_v3  ;;  %v214_v18 = vor.u32 %v213_v12, %v212_v5  ;;  %vm216_vm6 = vcmp.lt.s32.totalorder %v196_v53, 2  ;;  %v301_v30 = vand.u32 31, %v299_v19 }
 0x130   :  { %v219_v20 = vsel %vm215_vm2, %v199_v9, %v202_v13  ;;  %v220_v21 = vsel %vm218_vm5, %v208_v15, 2102212464  ;;  %v223_v22 = vsel %vm215_vm2, %v202_v13, %v205_v14  ;;  %v227_v23 = vsel %vm215_vm2, %v205_v14, %v208_v15 }
 0x131   :  { %v221_v24 = vsel %vm217_vm3, %v205_v14, %v220_v21  ;;  %v224_v25 = vsel %vm218_vm5, %v211_v17, 920167782  ;;  %v228_v26 = vsel %vm218_vm5, %v214_v18, 1326507024  ;;  %v300_v41 = vshrl.u32 %v299_v19, 5 }
 0x132   :  { %v225_v28 = vsel %vm217_vm3, %v208_v15, %v224_v25  ;;  %v229_v29 = vsel %vm217_vm3, %v211_v17, %v228_v26  ;;  %v222_v31 = vsel %vm216_vm6, %v219_v20, %v221_v24  ;;  %v302_v42 = vsub.s32 32, %v301_v30 }
 0x133   :  { %v226_v33 = vsel %vm216_vm6, %v223_v22, %v225_v28  ;;  %v230_v34 = vsel %vm216_vm6, %v227_v23, %v229_v29  ;;  %v238_v44 = vmul.u32 %v4279_v55, %v222_v31  ;;  %v304_v45 = vshll.u32 %v4030_v57, %v301_v30 }
 0x134   :  { %v4292_v36 = vmul.u32.u64.low %v4279_v55, %v230_v34  ;;  %v4293_v37 = vmul.u32.u64.high %v4279_v55, %v230_v34, %v4292_v36  ;;  %v4296_v38 = vmul.u32.u64.low %v4279_v55, %v226_v33  ;;  %v4297_v40 = vmul.u32.u64.high %v4279_v55, %v226_v33, %v4296_v38 }
 0x135   :  { %v307_v46 = vshll.u32 %v4031_v61, %v301_v30  ;;  %v310_v47 = vshll.u32 %v4032_v63, %v301_v30  ;;  %v305_v48 = vshrl.u32 %v4031_v61, %v302_v42  ;;  %v308_v49 = vshrl.u32 %v4032_v63, %v302_v42 }
 0x136   :  { %v311_v51 = vshrl.u32 %v4033_v2, %v302_v42  ;;  %v313_v52 = vshll.u32 %v4033_v2, %v301_v30  ;;  %vm240_vm7 = vc.u32 %v4293_v37, %v4296_v38  ;;  %v241_v53 = vadd.s32 1, %v4297_v40 }
 0x137   :  { %v314_v54 = vshrl.u32 %v4034_v4, %v302_v42  ;;  %v316_v56 = vshll.u32 %v4034_v4, %v301_v30  ;;  %v306_v58 = vor.u32 %v305_v48, %v304_v45  ;;  %v309_v59 = vor.u32 %v308_v49, %v307_v46 }
 0x138   :  { %v312_v60 = vor.u32 %v311_v51, %v310_v47  ;;  %v317_v62 = vshrl.u32 %v4035_v11, %v302_v42  ;;  %v242_v55 = vsel %vm240_vm7, %v241_v53, %v4297_v40  ;;  %vm319_vm8 = vcmp.lt.s32.totalorder %v300_v41, 1 }
 0x139   :  { %v315_v1 = vor.u32 %v314_v54, %v313_v52  ;;  %vm322_vm9 = vcmp.lt.s32.totalorder %v300_v41, 4  ;;  %v243_v61 = vadd.s32 %v242_v55, %v238_v44  ;;  %vm321_vm10 = vcmp.lt.s32.totalorder %v300_v41, 3 }
 0x13a   :  { %v318_v63 = vor.u32 %v317_v62, %v316_v56  ;;  %v324_v2 = vsel %vm322_vm9, %v312_v60, 2102212464  ;;  %v303_v3 = vshrl.u32 %v4030_v57, %v302_v42  ;;  %v327_v5 = vsel %vm319_vm8, %v306_v58, %v309_v59 }
 0x13b   :  { %v328_v6 = vsel %vm322_vm9, %v315_v1, 920167782  ;;  %v331_v7 = vsel %vm319_vm8, %v309_v59, %v312_v60  ;;  %v244_v8 = vadd.s32 536870912, %v243_v61  ;;  %vm320_vm11 = vcmp.lt.s32.totalorder %v300_v41, 2 }
 0x13c   :  { %v329_v4 = vsel %vm321_vm10, %v312_v60, %v328_v6  ;;  %v332_v9 = vsel %vm322_vm9, %v318_v63, 1326507024  ;;  %v323_v10 = vsel %vm319_vm8, %v303_v3, %v306_v58  ;;  %v325_v11 = vsel %vm321_vm10, %v309_v59, %v324_v2  ;;  %v3434_v3 = vld [vmem:[#allocation11 + $0x48] ss:$16 sps:$4 sm:$0xff]  }
 0x13d   :  { %v330_v12 = vsel %vm320_vm11, %v327_v5, %v329_v4  ;;  %v333_v13 = vsel %vm321_vm10, %v315_v1, %v332_v9  ;;  %v4307_v14 = vshrl.u32 %v244_v8, 30  ;;  %v326_v21 = vsel %vm320_vm11, %v323_v10, %v325_v11 }
 0x13e   :  { %v334_v15 = vsel %vm320_vm11, %v331_v7, %v333_v13  ;;  %v4309_v17 = vmul.u32.u64.low %v335_v43, %v330_v12  ;;  %v4310_v18 = vmul.u32.u64.high %v335_v43, %v330_v12, %v4309_v17  ;;  %v342_v24 = vmul.u32 %v335_v43, %v326_v21 }
 0x13f   :  { %v4312_v19 = vmul.u32.u64.low %v335_v43, %v334_v15  ;;  %v4313_v20 = vmul.u32.u64.high %v335_v43, %v334_v15, %v4312_v19  ;;  %v246_v57 = vshll.u32 %v4307_v14, 30  ;;  %v239_v41 = vadd.s32 %v4296_v38, %v4293_v37 }
 0x140   :  { %v345_v23 = vadd.s32 1, %v4310_v18  ;;  %v269_v11 = vsub.s32 4, %v4307_v14  ;;  %vm289_vm2 = vcmp.lt.s32.totalorder %v4273_v39, 0  ;;  %vm288_vm3 = vcmp.le.f32.partialorder %v287_v50, 0.7853982 }
 0x141   :  { %v247_v22 = vsub.s32 %v243_v61, %v246_v57  ;;  %vm344_vm12 = vc.u32 %v4313_v20, %v4309_v17  ;;  %v343_v62 = vadd.s32 %v4309_v17, %v4313_v20  ;;  %vm275_vm9 = vweird.f32 %v4269_v32 }
 0x142   :  { %v346_v26 = vsel %vm344_vm12, %v345_v23, %v4310_v18  ;;  %v270_v15 = vsel %vm185_vm15, %v269_v11, %v4307_v14  ;;  %vm609_vm11 = vcmask 130048   ;;  %vm379_vm12 = vweird.f32 %v4273_v39  ;;  %v3458_v11 = vld [vmem:[#allocation11 + $0xc8] ss:$16 sps:$4 sm:$0xff]  }
 0x143   :  { %v249_v25 = vsub.s32 0, %v247_v22  ;;  %v347_v27 = vadd.s32 %v346_v26, %v342_v24  ;;  %v272_v20 = vsel %vm4327_vm1, 0, %v270_v15  ;;  %v3470_v15 = vld [vmem:[#allocation11 + $0x108] ss:$16 sps:$4 sm:$0xff]  }
 0x144   :  { %v276_v26 = vadd.s32 3, %v272_v20 }
 0x145   :  { %v3007_v28 = vmin.u32 %v249_v25, %v247_v22  ;;  %v348_v29 = vadd.s32 536870912, %v347_v27 }
 0x147   :  { %v251_v30 = vclz %v3007_v28  ;;  %v349_v31 = vshrl.u32 %v348_v29, 30 }
 0x149   :  { %v3008_v33 = vadd.s32 4294967294, %v251_v30  ;;  %v350_v34 = vshll.u32 %v349_v31, 30  ;;  %v373_v35 = vsub.s32 4, %v349_v31 }
 0x14b   :  { %vm3009_vm13 = vcmp.lt.s32.totalorder %v3008_v33, 0  ;;  %v351_v40 = vsub.s32 %v347_v27, %v350_v34  ;;  %v374_v18 = vsel %vm289_vm2, %v373_v35, %v349_v31  ;;  %v277_v34 = vand.u32 3, %v276_v26  ;;  %v3464_v35 = vld [vmem:[#allocation11 + $0xe8] ss:$16 sps:$4 sm:$0xff]  }
 0x14c   :  { %v254_v36 = vsel %vm3009_vm13, 0, %v3008_v33  ;;  %v376_v21 = vsel %vm288_vm3, 0, %v374_v18  ;;  %v3476_v18 = vld [vmem:[#allocation11 + $0x128] ss:$16 sps:$4 sm:$0xff]  }
 0x14d   :  { %v255_v42 = vsub.s32 32, %v254_v36  ;;  %v259_v43 = vsub.s32 4294967266, %v254_v36  ;;  %v353_v44 = vsub.s32 0, %v351_v40  ;;  %v256_v45 = vshll.u32 %v247_v22, %v254_v36 }
 0x14e   :  { %v485_v22 = vand.u32 3, %v272_v20  ;;  %v380_v50 = vadd.s32 3, %v376_v21  ;;  %v588_v25 = vand.u32 3, %v376_v21  ;;  %v3482_v20 = vld [vmem:[#allocation11 + $0x148] ss:$16 sps:$4 sm:$0xff]  }
 0x14f   :  { %v257_v46 = vshrl.u32 %v239_v41, %v255_v42  ;;  %v260_v47 = vadd.s32 127, %v259_v43  ;;  %v3011_v48 = vmin.u32 %v353_v44, %v351_v40  ;;  %v3488_v21 = vld [vmem:[#allocation11 + $0x168] ss:$16 sps:$4 sm:$0xff]  }
 0x150   :  { %vm487_vm4 = vcmp.eq.s32.totalorder %v485_v22, 0  ;;  %vm490_vm5 = vcmp.eq.s32.totalorder %v485_v22, 2  ;;  %v381_v30 = vand.u32 3, %v380_v50  ;;  %vm486_vm6 = vcmp.lt.s32.totalorder %v485_v22, 2  ;;  %v3496_v22 = vld [vmem:[#allocation11 + $0x18c] ss:$16 sps:$4 sm:$0xff]  }
 0x151   :  { %v258_v49 = vor.u32 %v257_v46, %v256_v45  ;;  %v261_v51 = vshll.u32 %v260_v47, 23  ;;  %v355_v52 = vclz %v3011_v48  ;;  %vm593_vm7 = vcmp.eq.s32.totalorder %v588_v25, 2  ;;  %v3388_v47 = vld [vmem:[#allocation5] sm:$0xff]   ;;  %v3500_v50 = vld [vmem:[#allocation11 + $0x1a8] ss:$16 sps:$4 sm:$0xff]  }
 0x152   :  { %vm590_vm8 = vcmp.eq.s32.totalorder %v588_v25, 0  ;;  %vm589_vm10 = vcmp.lt.s32.totalorder %v588_v25, 2  ;;  %vm383_vm13 = vcmp.eq.s32.totalorder %v381_v30, 0 }
 0x153   :  { %v262_v53 = vor.u32 4788187, %v261_v51  ;;  %v3012_v54 = vadd.s32 4294967294, %v355_v52  ;;  %v265_v58 = vcvt.s32.f32 %v258_v49 }
 0x155   :  { %v263_v56 = vand.u32 2147483647, %v262_v53  ;;  %vm3013_vm14 = vcmp.lt.s32.totalorder %v3012_v54, 0 }
 0x156   :  { %v358_v60 = vsel %vm3013_vm14, 0, %v3012_v54  ;;  %vm386_vm14 = vcmp.eq.s32.totalorder %v381_v30, 2 }
 0x157   :  { %v266_v59 = vmul.f32 %v265_v58, %v263_v56  ;;  %v359_v37 = vsub.s32 32, %v358_v60  ;;  %v363_v38 = vsub.s32 4294967266, %v358_v60  ;;  %v360_v1 = vshll.u32 %v351_v40, %v358_v60  ;;  %v3422_v60 = vld [vmem:[#allocation11 + $0x8] ss:$16 sps:$4 sm:$0xff]  }
 0x159   :  { %v267_v55 = vxor.u32 2147483648, %v266_v59  ;;  %v361_v61 = vshrl.u32 %v343_v62, %v359_v37  ;;  %v364_v63 = vadd.s32 127, %v363_v38  ;;  %v3424_v62 = vld [vmem:[#allocation11 + $0xc] ss:$16 sps:$4 sm:$0xff]  }
 0x15a   :  { %1456 = vmatprep.subr.bf16.mxu1 %v3424_v62  ;;  %v3430_v38 = vld [vmem:[#allocation11 + $0x2c] ss:$16 sps:$4 sm:$0xff]   ;;  %v3451_v62 = vld [vmem:[#allocation11 + $0xa4] ss:$16 sps:$4 sm:$0xff]  }
 0x15b   :  { %v268_v2 = vsel %vm185_vm15, %v267_v55, %v266_v59  ;;  %v362_v5 = vor.u32 %v361_v61, %v360_v1  ;;  %v365_v6 = vshll.u32 %v364_v63, 23  ;;  %vm279_vm15 = vcmp.eq.s32.totalorder %v277_v34, 0  ;;  %v3415_v59 = vld [vmem:[%s4519_s6 + $0x4] ss:$8 sps:$4 sm:$0xff]   ;;  %1457 = vmatpush1.bf16.msra.mxu1 %v3422_v60 }
 0x15c   :  { %v271_v7 = vsel %vm4327_vm1, %v4269_v32, %v268_v2  ;;  %vm282_vm1 = vcmp.eq.s32.totalorder %v277_v34, 2  ;;  %v3418_v32 = vld [vmem:[%s4519_s6 + $0x14] ss:$8 sps:$4 sm:$0xff]   ;;  %1458 = vmatprep.subr.bf16.mxu1 %v3430_v38 }
 0x15d   :  { %v366_v8 = vor.u32 4788187, %v365_v6  ;;  %3747 = vcosq.f32 %v271_v7  ;;  %v369_v9 = vcvt.s32.f32 %v362_v5  ;;  %v3428_v1 = vld [vmem:[#allocation11 + $0x28] ss:$16 sps:$4 sm:$0xff]   ;;  %v3436_v2 = vld [vmem:[#allocation11 + $0x4c] ss:$16 sps:$4 sm:$0xff]  }
 0x15e   :  { %3749 = vsinq.f32 %v271_v7  ;;  %v3442_v5 = vld [vmem:[#allocation11 + $0x6c] ss:$16 sps:$4 sm:$0xff]   ;;  %v3440_v6 = vld [vmem:[#allocation11 + $0x68] ss:$16 sps:$4 sm:$0xff]   ;;  %v3443_v60 = vld [vmem:[#allocation11 + $0x80] ss:$16 sps:$4 sm:$0xff]  }
 0x15f   :  { %v367_v4 = vand.u32 2147483647, %v366_v8  ;;  %1459 = vmatpush1.bf16.msra.mxu1 %v3428_v1  ;;  %v3448_v7 = vld [vmem:[#allocation11 + $0x8c] ss:$16 sps:$4 sm:$0xff]   ;;  %v3446_v8 = vld [vmem:[#allocation11 + $0x88] ss:$16 sps:$4 sm:$0xff]  }
 0x160   :  { %1460 = vmatprep.subr.bf16.mxu1 %v3436_v2  ;;  %v3449_v38 = vld [vmem:[#allocation11 + $0xa0] ss:$16 sps:$4 sm:$0xff]   ;;  %v3457_v1 = vld [vmem:[#allocation11 + $0xc4] ss:$16 sps:$4 sm:$0xff]  }
 0x161   :  { %v370_v10 = vmul.f32 %v369_v9, %v367_v4  ;;  %v3454_v4 = vld [vmem:[#allocation11 + $0xac] ss:$16 sps:$4 sm:$0xff]   ;;  %v3452_v9 = vld [vmem:[#allocation11 + $0xa8] ss:$16 sps:$4 sm:$0xff]   ;;  %v3455_v2 = vld [vmem:[#allocation11 + $0xc0] ss:$16 sps:$4 sm:$0xff]  }
 0x163   :  { %v371_v12 = vxor.u32 2147483648, %v370_v10  ;;  %1461 = vmatpush1.bf16.msra.mxu1 %v3434_v3  ;;  %v3463_v3 = vld [vmem:[#allocation11 + $0xe4] ss:$16 sps:$4 sm:$0xff]  }
 0x164   :  { %1462 = vmatprep.subr.bf16.mxu1 %v3442_v5  ;;  %v3461_v5 = vld [vmem:[#allocation11 + $0xe0] ss:$16 sps:$4 sm:$0xff]  }
 0x165   :  { %v372_v13 = vsel %vm289_vm2, %v371_v12, %v370_v10  ;;  %vm382_vm2 = vcmp.lt.s32.totalorder %v381_v30, 2  ;;  %v3460_v10 = vld [vmem:[#allocation11 + $0xcc] ss:$16 sps:$4 sm:$0xff]  }
 0x166   :  { %v375_v17 = vsel %vm288_vm3, %v4273_v39, %v372_v13  ;;  %vm278_vm3 = vcmp.lt.s32.totalorder %v277_v34, 2  ;;  %v3416_v39 = vld [vmem:[%s4519_s6 + $0x10] ss:$8 sps:$4 sm:$0xff]  }
 0x167   :  { %3751 = vcosq.f32 %v375_v17  ;;  %v3748_v19 = vpop.eup %3747  ;;  %1463 = vmatpush1.bf16.msra.mxu1 %v3440_v6  ;;  %v3466_v12 = vld [vmem:[#allocation11 + $0xec] ss:$16 sps:$4 sm:$0xff]   ;;  %v3469_v6 = vld [vmem:[#allocation11 + $0x104] ss:$16 sps:$4 sm:$0xff]  }
 0x168   :  { %3753 = vsinq.f32 %v375_v17  ;;  %v3750_v57 = vpop.eup %3749  ;;  %v283_v24 = vxor.u32 2147483648, %v3748_v19  ;;  %1464 = vmatprep.subr.bf16.mxu1 %v3448_v7  ;;  %v3472_v13 = vld [vmem:[#allocation11 + $0x10c] ss:$16 sps:$4 sm:$0xff]   ;;  %v3467_v7 = vld [vmem:[#allocation11 + $0x100] ss:$16 sps:$4 sm:$0xff]  }
 0x169   :  { %v280_v23 = vxor.u32 2147483648, %v3750_v57  ;;  %v3478_v17 = vld [vmem:[#allocation11 + $0x12c] ss:$16 sps:$4 sm:$0xff]  }
 0x16a   :  { %v492_v28 = vsel %vm490_vm5, %v283_v24, %v3750_v57  ;;  %v284_v51 = vsel %vm282_vm1, %v283_v24, %v3750_v57  ;;  %v3490_v57 = vld [vmem:[#allocation11 + $0x16c] ss:$16 sps:$4 sm:$0xff]  }
 0x16b   :  { %v489_v27 = vsel %vm487_vm4, %v3748_v19, %v280_v23  ;;  %v281_v49 = vsel %vm279_vm15, %v3748_v19, %v280_v23  ;;  %1465 = vmatpush1.bf16.msra.mxu1 %v3446_v8  ;;  %v3484_v19 = vld [vmem:[#allocation11 + $0x14c] ss:$16 sps:$4 sm:$0xff]   ;;  %v3494_v23 = vld [vmem:[#allocation11 + $0x188] ss:$16 sps:$4 sm:$0xff]   ;;  %v3475_v8 = vld [vmem:[#allocation11 + $0x124] ss:$16 sps:$4 sm:$0xff]  }
 0x16c   :  { %v493_v36 = vsel %vm486_vm6, %v489_v27, %v492_v28  ;;  %v285_v53 = vsel %vm278_vm3, %v281_v49, %v284_v51  ;;  %1466 = vmatprep.subr.bf16.mxu1 %v3454_v4  ;;  %v3502_v24 = vld [vmem:[#allocation11 + $0x1ac] ss:$16 sps:$4 sm:$0xff]   ;;  %v3473_v4 = vld [vmem:[#allocation11 + $0x120] ss:$16 sps:$4 sm:$0xff]  }
 0x16d   :  { %v494_v45 = vsel %vm275_vm9, nan, %v493_v36  ;;  %v286_v56 = vsel %vm275_vm9, nan, %v285_v53  ;;  %v3419_v53 = vld [vmem:[#allocation11] ss:$16 sps:$4 sm:$0xff]  }
 0x16f   :  { %1467 = vmatpush1.bf16.msra.mxu1 %v3452_v9  ;;  %v3481_v9 = vld [vmem:[#allocation11 + $0x144] ss:$16 sps:$4 sm:$0xff]  }
 0x170   :  { %1468 = vmatprep.subr.bf16.mxu1 %v3460_v10  ;;  %v3479_v10 = vld [vmem:[#allocation11 + $0x140] ss:$16 sps:$4 sm:$0xff]  }
 0x171   :  { %v3752_v14 = vpop.eup %3751 }
 0x172   :  { %v3754_v29 = vpop.eup %3753  ;;  %v387_v31 = vxor.u32 2147483648, %v3752_v14 }
 0x173   :  { %v384_v33 = vxor.u32 2147483648, %v3754_v29  ;;  %1469 = vmatpush1.bf16.msra.mxu1 %v3458_v11  ;;  %v3487_v11 = vld [vmem:[#allocation11 + $0x164] ss:$16 sps:$4 sm:$0xff]  }
 0x174   :  { %v595_v40 = vsel %vm593_vm7, %v387_v31, %v3754_v29  ;;  %v388_v44 = vsel %vm386_vm14, %v387_v31, %v3754_v29  ;;  %1470 = vmatprep.subr.bf16.mxu1 %v3466_v12  ;;  %v3026_v29 = vld [vmem:[#allocation8] ss:$0 sm:$0xff]  ;;  %v3485_v12 = vld [vmem:[#allocation11 + $0x160] ss:$16 sps:$4 sm:$0xff]  }
 0x175   :  { %v592_v41 = vsel %vm590_vm8, %v3752_v14, %v384_v33  ;;  %v385_v43 = vsel %vm383_vm13, %v3752_v14, %v384_v33 }
 0x176   :  { %v596_v42 = vsel %vm589_vm10, %v592_v41, %v595_v40  ;;  %v389_v52 = vsel %vm382_vm2, %v385_v43, %v388_v44 }
 0x177   :  { %v597_v46 = vsel %vm379_vm12, nan, %v596_v42  ;;  %v390_v54 = vsel %vm379_vm12, nan, %v389_v52  ;;  %1471 = vmatpush1.bf16.msra.mxu1 %v3464_v35  ;;  %v3493_v35 = vld [vmem:[#allocation11 + $0x184] ss:$16 sps:$4 sm:$0xff]  }
 0x178   :  { %v598_v48 = vpack.c.bf16 %v597_v46, %v494_v45  ;;  %v391_v58 = vpack.c.bf16 %v390_v54, %v286_v56  ;;  %1472 = vmatprep.subr.bf16.mxu1 %v3472_v13  ;;  %v3427_v56 = vld [vmem:[#allocation11 + $0x24] ss:$16 sps:$4 sm:$0xff]   ;;  %v3491_v13 = vld [vmem:[#allocation11 + $0x180] ss:$16 sps:$4 sm:$0xff]  }
 0x17a   :  { %3328 = vmatmul.mubr.msk.bf16.vlgmr.msra.gmra.mrb[0].mxu0 %vm609_vm11, %v598_v48 }
 0x17b   :  { %3332 = vmatpush3.bf16.msra.mxu0 %v3388_v47  ;;  %3333 = vmatprep.mubr.msk.bf16.mxu0 %vm4029_vm0, %v4028_v16  ;;  %v3413_v16 = vld [vmem:[%s4519_s6] ss:$8 sps:$4 sm:$0xff]   ;;  %vm764_vm0 = vcmask 261120  }
 0x17c   :  { %768 = vmatprep.subr.bf16.mxu0 %v3415_v59  ;;  %1473 = vmatpush1.bf16.msra.mxu1 %v3470_v15  ;;  %v3433_v59 = vld [vmem:[#allocation11 + $0x44] ss:$16 sps:$4 sm:$0xff]  }
 0x17d   :  { %1474 = vmatprep.subr.bf16.mxu1 %v3478_v17  ;;  %v3499_v15 = vld [vmem:[#allocation11 + $0x1a4] ss:$16 sps:$4 sm:$0xff]   ;;  %v3497_v17 = vld [vmem:[#allocation11 + $0x1a0] ss:$16 sps:$4 sm:$0xff]  }
 0x180   :  { %1475 = vmatpush1.bf16.msra.mxu1 %v3476_v18  ;;  %v3505_v18 = vld [vmem:[#allocation11 + $0x1c4] ss:$16 sps:$4 sm:$0xff]  }
 0x181   :  { %1476 = vmatprep.subr.bf16.mxu1 %v3484_v19  ;;  %v3508_v19 = vld [vmem:[#allocation11 + $0x1cc] ss:$16 sps:$4 sm:$0xff]  }
 0x182   :  { %3334 = vmatmul.mubr.msk.bf16.vlgmr.msra.gmra.mrb[4].mxu0 %vm609_vm11, %v391_v58  ;;  %v3425_v58 = vld [vmem:[#allocation11 + $0x20] ss:$16 sps:$4 sm:$0xff]  }
 0x183   :  { %800 = vmatprep.mubr.bf16.mxu0 %v4027_v0  ;;  %769 = vmatpush1.bf16.msra.mxu0 %v3413_v16  ;;  %v3421_v0 = vld [vmem:[#allocation11 + $0x4] ss:$16 sps:$4 sm:$0xff]   ;;  %v3431_v16 = vld [vmem:[#allocation11 + $0x40] ss:$16 sps:$4 sm:$0xff]  }
 0x184   :  { %770 = vmatprep.subr.bf16.mxu0 %v3418_v32  ;;  %1477 = vmatpush1.bf16.msra.mxu1 %v3482_v20  ;;  %v3439_v32 = vld [vmem:[#allocation11 + $0x64] ss:$16 sps:$4 sm:$0xff]   ;;  %v3503_v20 = vld [vmem:[#allocation11 + $0x1c0] ss:$16 sps:$4 sm:$0xff]  }
 0x185   :  { %1478 = vmatprep.subr.bf16.mxu1 %v3490_v57  ;;  %v3506_v57 = vld [vmem:[#allocation11 + $0x1c8] ss:$16 sps:$4 sm:$0xff]  }
 0x187   :  { %771 = vmatpush1.bf16.msra.mxu0 %v3416_v39  ;;  %v3437_v39 = vld [vmem:[#allocation11 + $0x60] ss:$16 sps:$4 sm:$0xff]  }
 0x188   :  { %1413 = vmatprep.subr.bf16.mxu0 %v3421_v0  ;;  %1479 = vmatpush1.bf16.msra.mxu1 %v3488_v21  ;;  %v3445_v0 = vld [vmem:[#allocation11 + $0x84] ss:$16 sps:$4 sm:$0xff]   ;;  %v3509_v21 = vld [vmem:[#allocation11 + $0x1e0] ss:$16 sps:$4 sm:$0xff]  }
 0x189   :  { %1480 = vmatprep.subr.bf16.mxu1 %v3496_v22  ;;  %v3511_v22 = vld [vmem:[#allocation11 + $0x1e4] ss:$16 sps:$4 sm:$0xff]  }
 0x18c   :  { %v4371_v37 = vpop.f32.mrb[0].mxu1  ;;  %1481 = vmatpush1.bf16.msra.mxu1 %v3494_v23  ;;  %v3512_v23 = vld [vmem:[#allocation11 + $0x1e8] ss:$16 sps:$4 sm:$0xff]  }
 0x18d   :  { %v4373_v55 = vpop.f32.mrb[1].mxu1  ;;  %1482 = vmatprep.subr.bf16.mxu1 %v3502_v24  ;;  %v3514_v24 = vld [vmem:[#allocation11 + $0x1ec] ss:$16 sps:$4 sm:$0xff]  }
 0x18e   :  { %v4375_v61 = vpop.f32.mrb[2].mxu1 }
 0x18f   :  { %v4377_v63 = vpop.f32.mrb[3].mxu1 }
 0x190   :  { %1483 = vmatpush1.bf16.msra.mxu1 %v3500_v50  ;;  %v3517_v50 = vld [vmem:[#allocation13 + $0x4] ss:$16 sps:$4 sm:$0xff]  }
 0x191   :  { %1484 = vmatprep.subr.bf16.mxu1 %v3508_v19 }
 0x194   :  { %1485 = vmatpush1.bf16.msra.mxu1 %v3506_v57 }
 0x195   :  { %1486 = vmatprep.subr.bf16.mxu1 %v3514_v24 }
 0x198   :  { %1487 = vmatpush1.bf16.msra.mxu1 %v3512_v23 }
 0x24d   :  { %v647_v25 = vpop.f32.mrb[0].mxu0 }
 0x24e   :  { %v3329_v26 = vpop.f32.mrb[1].mxu0 }
 0x24f   :  { %v650_v14 = vpop.f32.mrb[2].mxu0  ;;  %v734_v26 = vlaneseq }
 0x250   :  { %v3330_v27 = vpop.f32.mrb[3].mxu0 }
 0x255   :  { %v697_v28 = vpop.f32.mrb[4].mxu0 }
 0x256   :  { %v698_v30 = vadd.f32 %v697_v28, %v647_v25  ;;  %v3335_v31 = vpop.f32.mrb[5].mxu0  ;;  %v3520_v25 = vld [vmem:[#allocation13 + $0xc] ss:$16 sps:$4 sm:$0xff]   ;;  %v830_v28 = vld [vmem:[%s4522_s9] sm:$0x3] }
 0x257   :  { %v700_v33 = vpop.f32.mrb[6].mxu0  ;;  %2451 = vmatprep.subr.bf16.mxu1 %v3520_v25 }
 0x258   :  { %v711_v34 = vadd.f32 %v3026_v29, %v698_v30  ;;  %v701_v36 = vadd.f32 %v700_v33, %v650_v14  ;;  %v3336_v40 = vpop.f32.mrb[7].mxu0  ;;  %v4379_v14 = vshrl.u32 %v734_v26, 7  ;;  %v3515_v26 = vld [vmem:[#allocation13] ss:$16 sps:$4 sm:$0xff]  }
 0x25a   :  { %v3027_v41 = vmul.f32 -1.442695, %v711_v34  ;;  %v712_v42 = vadd.f32 %v3026_v29, %v701_v36  ;;  %v4382_v27 = vsub.s32 0, %v4379_v14  ;;  %v4388_v29 = vsub.s32 1, %v4379_v14 }
 0x25c   :  { %3755 = vpow2.f32 %v3027_v41  ;;  %v3028_v43 = vmul.f32 -1.442695, %v712_v42  ;;  %v835_v30 = vrot.slane %v830_v28, %v4382_v27  ;;  %v839_v31 = vrot.slane %v830_v28, %v4388_v29  ;;  %v3518_v28 = vld [vmem:[#allocation13 + $0x8] ss:$16 sps:$4 sm:$0xff]  }
 0x25e   :  { %3757 = vpow2.f32 %v3028_v43  ;;  %v957_v33 = vadd.f32 %v4371_v37, %v835_v30  ;;  %v961_v36 = vadd.f32 %v4375_v61, %v835_v30  ;;  %v963_v40 = vadd.f32 %v4377_v63, %v839_v31  ;;  %v3523_v30 = vld [vmem:[#allocation13 + $0x24] ss:$16 sps:$4 sm:$0xff]  }
 0x260   :  { %v969_v41 = vmul.f32 %v957_v33, %v957_v33  ;;  %v971_v43 = vmul.f32 %v961_v36, %v961_v36 }
 0x266   :  { %v3756_v44 = vpop.eup %3755 }
 0x267   :  { %v719_v45 = vadd.f32 1.0, %v3756_v44  ;;  %v972_v44 = vmul.f32 %v963_v40, %v963_v40 }
 0x268   :  { %v3758_v46 = vpop.eup %3757 }
 0x269   :  { %3759 = vrcp.f32 %v719_v45  ;;  %v720_v47 = vadd.f32 1.0, %v3758_v46  ;;  %v973_v45 = vmul.f32 %v969_v41, %v957_v33  ;;  %v3527_v41 = vld [vmem:[#allocation13 + $0x40] ss:$16 sps:$4 sm:$0xff]  }
 0x26b   :  { %3761 = vrcp.f32 %v720_v47  ;;  %v975_v47 = vmul.f32 %v971_v43, %v961_v36  ;;  %v3535_v43 = vld [vmem:[#allocation13 + $0x64] ss:$16 sps:$4 sm:$0xff]  }
 0x273   :  { %v3760_v48 = vpop.eup %3759 }
 0x274   :  { %v725_v51 = vmul.f32 %v3760_v48, %v711_v34  ;;  %v959_v34 = vadd.f32 %v4373_v55, %v839_v31  ;;  %v976_v48 = vmul.f32 %v972_v44, %v963_v40  ;;  %v3526_v31 = vld [vmem:[#allocation13 + $0x2c] ss:$16 sps:$4 sm:$0xff]  }
 0x275   :  { %v3762_v49 = vpop.eup %3761  ;;  %v3538_v44 = vld [vmem:[#allocation13 + $0x6c] ss:$16 sps:$4 sm:$0xff]  }
 0x276   :  { %v726_v52 = vmul.f32 %v3762_v49, %v712_v42  ;;  %v970_v42 = vmul.f32 %v959_v34, %v959_v34  ;;  %v977_v49 = vmul.f32 0.044715, %v973_v45  ;;  %v3533_v45 = vld [vmem:[#allocation13 + $0x60] ss:$16 sps:$4 sm:$0xff]  }
 0x278   :  { %v727_v54 = vpack.c.bf16 %v726_v52, %v725_v51  ;;  %v974_v46 = vmul.f32 %v970_v42, %v959_v34  ;;  %v979_v52 = vmul.f32 0.044715, %v975_v47  ;;  %v3530_v42 = vld [vmem:[#allocation13 + $0x48] ss:$16 sps:$4 sm:$0xff]   ;;  %v3541_v47 = vld [vmem:[#allocation13 + $0x84] ss:$16 sps:$4 sm:$0xff]  }
 0x27a   :  { %3033 = vmatmul.mubr.msk.bf16.vlgmr.msra.gmra.mrb[8].mxu0 %vm764_vm0, %v727_v54  ;;  %v978_v51 = vmul.f32 0.044715, %v974_v46  ;;  %v981_v54 = vadd.f32 %v977_v49, %v957_v33  ;;  %v3536_v46 = vld [vmem:[#allocation13 + $0x68] ss:$16 sps:$4 sm:$0xff]   ;;  %v3539_v49 = vld [vmem:[#allocation13 + $0x80] ss:$16 sps:$4 sm:$0xff]  }
 0x27b   :  { %1414 = vmatpush1.bf16.msra.mxu0 %v3419_v53  ;;  %v980_v53 = vmul.f32 0.044715, %v976_v48  ;;  %v3544_v48 = vld [vmem:[#allocation13 + $0x8c] ss:$16 sps:$4 sm:$0xff]  }
 0x27c   :  { %1415 = vmatprep.subr.bf16.mxu0 %v3427_v56  ;;  %v982_v37 = vadd.f32 %v978_v51, %v959_v34  ;;  %v983_v56 = vadd.f32 %v979_v52, %v961_v36  ;;  %v3542_v51 = vld [vmem:[#allocation13 + $0x88] ss:$16 sps:$4 sm:$0xff]   ;;  %v3547_v52 = vld [vmem:[#allocation13 + $0xa4] ss:$16 sps:$4 sm:$0xff]  }
 0x27d   :  { %v984_v55 = vadd.f32 %v980_v53, %v963_v40  ;;  %v3550_v53 = vld [vmem:[#allocation13 + $0xac] ss:$16 sps:$4 sm:$0xff]  }
 0x27e   :  { %v986_v61 = vmul.f32 0.7978846, %v982_v37  ;;  %v3548_v37 = vld [vmem:[#allocation13 + $0xa8] ss:$16 sps:$4 sm:$0xff]  }
 0x27f   :  { %1416 = vmatpush1.bf16.msra.mxu0 %v3425_v58  ;;  %v985_v58 = vmul.f32 0.7978846, %v981_v54  ;;  %v988_v63 = vmul.f32 0.7978846, %v984_v55  ;;  %v3545_v54 = vld [vmem:[#allocation13 + $0xa0] ss:$16 sps:$4 sm:$0xff]  }
 0x280   :  { %1417 = vmatprep.subr.bf16.mxu0 %v3433_v59  ;;  %v987_v59 = vmul.f32 0.7978846, %v983_v56  ;;  %v3553_v56 = vld [vmem:[#allocation13 + $0xc4] ss:$16 sps:$4 sm:$0xff]   ;;  %v3556_v55 = vld [vmem:[#allocation13 + $0xcc] ss:$16 sps:$4 sm:$0xff]  }
 0x281   :  { %3763 = vtanh.f32 %v985_v58  ;;  %v3551_v58 = vld [vmem:[#allocation13 + $0xc0] ss:$16 sps:$4 sm:$0xff]  }
 0x282   :  { %3765 = vtanh.f32 %v986_v61  ;;  %v3554_v61 = vld [vmem:[#allocation13 + $0xc8] ss:$16 sps:$4 sm:$0xff]  }
 0x283   :  { %1418 = vmatpush1.bf16.msra.mxu0 %v3431_v16  ;;  %3767 = vtanh.f32 %v987_v59  ;;  %v3559_v59 = vld [vmem:[#allocation13 + $0xe4] ss:$16 sps:$4 sm:$0xff]  }
 0x284   :  { %1419 = vmatprep.subr.bf16.mxu0 %v3439_v32  ;;  %3769 = vtanh.f32 %v988_v63  ;;  %v732_v32 = vld [vmem:[%s4520_s7] sm:$0x3]  ;;  %v3562_v63 = vld [vmem:[#allocation13 + $0xec] ss:$16 sps:$4 sm:$0xff]  }
 0x287   :  { %1420 = vmatpush1.bf16.msra.mxu0 %v3437_v39 }
 0x288   :  { %1421 = vmatprep.subr.bf16.mxu0 %v3445_v0 }
 0x28b   :  { %1422 = vmatpush1.bf16.msra.mxu0 %v3443_v60  ;;  %v3764_v16 = vpop.eup %3763 }
 0x28c   :  { %1423 = vmatprep.subr.bf16.mxu0 %v3451_v62  ;;  %v3766_v39 = vpop.eup %3765  ;;  %v737_v62 = vrot.slane %v732_v32, %v4382_v27 }
 0x28d   :  { %v3768_v0 = vpop.eup %3767 }
 0x28e   :  { %v3770_v60 = vpop.eup %3769 }
 0x28f   :  { %1424 = vmatpush1.bf16.msra.mxu0 %v3449_v38  ;;  %v965_v38 = vmul.f32 0.5, %v957_v33  ;;  %v3521_v33 = vld [vmem:[#allocation13 + $0x20] ss:$16 sps:$4 sm:$0xff]  }
 0x290   :  { %1425 = vmatprep.subr.bf16.mxu0 %v3457_v1  ;;  %v993_v1 = vadd.f32 1.0, %v3764_v16  ;;  %v3557_v16 = vld [vmem:[#allocation13 + $0xe0] ss:$16 sps:$4 sm:$0xff]  }
 0x293   :  { %1426 = vmatpush1.bf16.msra.mxu0 %v3455_v2  ;;  %v741_v2 = vrot.slane %v732_v32, %v4388_v29  ;;  %v3560_v32 = vld [vmem:[#allocation13 + $0xe8] ss:$16 sps:$4 sm:$0xff]  }
 0x294   :  { %1427 = vmatprep.subr.bf16.mxu0 %v3463_v3  ;;  %v966_v3 = vmul.f32 0.5, %v959_v34  ;;  %v3524_v34 = vld [vmem:[#allocation13 + $0x28] ss:$16 sps:$4 sm:$0xff]  }
 0x297   :  { %1428 = vmatpush1.bf16.msra.mxu0 %v3461_v5  ;;  %v994_v5 = vadd.f32 1.0, %v3766_v39  ;;  %v3565_v39 = vld [vmem:[#allocation13 + $0x104] ss:$16 sps:$4 sm:$0xff]  }
 0x298   :  { %1429 = vmatprep.subr.bf16.mxu0 %v3469_v6  ;;  %v967_v6 = vmul.f32 0.5, %v961_v36  ;;  %v3529_v36 = vld [vmem:[#allocation13 + $0x44] ss:$16 sps:$4 sm:$0xff]  }
 0x29b   :  { %1430 = vmatpush1.bf16.msra.mxu0 %v3467_v7  ;;  %v995_v7 = vadd.f32 1.0, %v3768_v0  ;;  %v3568_v0 = vld [vmem:[#allocation13 + $0x10c] ss:$16 sps:$4 sm:$0xff]  }
 0x29c   :  { %1431 = vmatprep.subr.bf16.mxu0 %v3475_v8 }
 0x29d   :  { %v999_v19 = vmul.f32 %v995_v7, %v967_v6  ;;  %v3580_v6 = vld [vmem:[#allocation13 + $0x14c] ss:$16 sps:$4 sm:$0xff]   ;;  %v3575_v7 = vld [vmem:[#allocation13 + $0x140] ss:$16 sps:$4 sm:$0xff]  }
 0x29f   :  { %1432 = vmatpush1.bf16.msra.mxu0 %v3473_v4  ;;  %v968_v4 = vmul.f32 0.5, %v963_v40  ;;  %v3532_v40 = vld [vmem:[#allocation13 + $0x4c] ss:$16 sps:$4 sm:$0xff]  }
 0x2a0   :  { %1433 = vmatprep.subr.bf16.mxu0 %v3481_v9  ;;  %v996_v9 = vadd.f32 1.0, %v3770_v60  ;;  %v3563_v60 = vld [vmem:[#allocation13 + $0x100] ss:$16 sps:$4 sm:$0xff]  }
 0x2a3   :  { %1434 = vmatpush1.bf16.msra.mxu0 %v3479_v10 }
 0x2a4   :  { %1435 = vmatprep.subr.bf16.mxu0 %v3487_v11  ;;  %v997_v11 = vmul.f32 %v993_v1, %v965_v38  ;;  %v3571_v38 = vld [vmem:[#allocation13 + $0x124] ss:$16 sps:$4 sm:$0xff]   ;;  %v3574_v1 = vld [vmem:[#allocation13 + $0x12c] ss:$16 sps:$4 sm:$0xff]  }
 0x2a7   :  { %1436 = vmatpush1.bf16.msra.mxu0 %v3485_v12 }
 0x2a8   :  { %1437 = vmatprep.subr.bf16.mxu0 %v3493_v35 }
 0x2ab   :  { %1438 = vmatpush1.bf16.msra.mxu0 %v3491_v13  ;;  %v998_v13 = vmul.f32 %v994_v5, %v966_v3  ;;  %v3572_v3 = vld [vmem:[#allocation13 + $0x128] ss:$16 sps:$4 sm:$0xff]   ;;  %v3577_v5 = vld [vmem:[#allocation13 + $0x144] ss:$16 sps:$4 sm:$0xff]  }
 0x2ac   :  { %1439 = vmatprep.subr.bf16.mxu0 %v3499_v15 }
 0x2af   :  { %1440 = vmatpush1.bf16.msra.mxu0 %v3497_v17 }
 0x2b0   :  { %1441 = vmatprep.subr.bf16.mxu0 %v3505_v18 }
 0x2b3   :  { %1442 = vmatpush1.bf16.msra.mxu0 %v3503_v20 }
 0x2b4   :  { %1443 = vmatprep.subr.bf16.mxu0 %v3511_v22  ;;  %v1000_v22 = vmul.f32 %v996_v9, %v968_v4  ;;  %v3583_v4 = vld [vmem:[#allocation13 + $0x164] ss:$16 sps:$4 sm:$0xff]   ;;  %v3586_v9 = vld [vmem:[#allocation13 + $0x16c] ss:$16 sps:$4 sm:$0xff]  }
 0x2b7   :  { %1444 = vmatpush1.bf16.msra.mxu0 %v3509_v21 }
 0x2b8   :  { %2365 = vmatprep.subr.bf16.mxu0 %v3517_v50 }
 0x34d   :  { %v802_v8 = vpop.f32.mrb[8].mxu0 }
 0x34e   :  { %v803_v10 = vadd.f32 %v802_v8, %v737_v62  ;;  %v804_v12 = vpop.f32.mrb[9].mxu0  ;;  %v3578_v8 = vld [vmem:[#allocation13 + $0x148] ss:$16 sps:$4 sm:$0xff]  }
 0x34f   :  { %v805_v35 = vadd.f32 %v804_v12, %v741_v2  ;;  %v806_v15 = vpop.f32.mrb[10].mxu0  ;;  %v3589_v12 = vld [vmem:[#allocation13 + $0x184] ss:$16 sps:$4 sm:$0xff]  }
 0x350   :  { %v1001_v17 = vadd.f32 %v997_v11, %v803_v10  ;;  %v807_v18 = vadd.f32 %v806_v15, %v737_v62  ;;  %v808_v20 = vpop.f32.mrb[11].mxu0  ;;  %v3566_v62 = vld [vmem:[#allocation13 + $0x108] ss:$16 sps:$4 sm:$0xff]   ;;  %v3581_v10 = vld [vmem:[#allocation13 + $0x160] ss:$16 sps:$4 sm:$0xff]  }
 0x351   :  { %v1002_v57 = vadd.f32 %v998_v13, %v805_v35  ;;  %v809_v21 = vadd.f32 %v808_v20, %v741_v2  ;;  %v3569_v2 = vld [vmem:[#allocation13 + $0x120] ss:$16 sps:$4 sm:$0xff]   ;;  %v3584_v11 = vld [vmem:[#allocation13 + $0x168] ss:$16 sps:$4 sm:$0xff]   ;;  %v3592_v35 = vld [vmem:[#allocation13 + $0x18c] ss:$16 sps:$4 sm:$0xff]  }
 0x352   :  { %v1003_v23 = vadd.f32 %v999_v19, %v807_v18  ;;  %v3587_v13 = vld [vmem:[#allocation13 + $0x180] ss:$16 sps:$4 sm:$0xff]   ;;  %v3590_v15 = vld [vmem:[#allocation13 + $0x188] ss:$16 sps:$4 sm:$0xff]   ;;  %v3598_v18 = vld [vmem:[#allocation13 + $0x1ac] ss:$16 sps:$4 sm:$0xff]  }
 0x353   :  { %v1004_v24 = vadd.f32 %v1000_v22, %v809_v21  ;;  %v3593_v19 = vld [vmem:[#allocation13 + $0x1a0] ss:$16 sps:$4 sm:$0xff]   ;;  %v3596_v20 = vld [vmem:[#allocation13 + $0x1a8] ss:$16 sps:$4 sm:$0xff]   ;;  %v3604_v21 = vld [vmem:[#allocation13 + $0x1cc] ss:$16 sps:$4 sm:$0xff]  }
 0x354   :  { %v1005_v50 = vpack.c.bf16 %v1003_v23, %v1001_v17  ;;  %v3595_v17 = vld [vmem:[#allocation13 + $0x1a4] ss:$16 sps:$4 sm:$0xff]   ;;  %v3599_v22 = vld [vmem:[#allocation13 + $0x1c0] ss:$16 sps:$4 sm:$0xff]   ;;  %v3602_v23 = vld [vmem:[#allocation13 + $0x1c8] ss:$16 sps:$4 sm:$0xff]  }
 0x355   :  { %v1006_v25 = vpack.c.bf16 %v1004_v24, %v1002_v57  ;;  %v3601_v57 = vld [vmem:[#allocation13 + $0x1c4] ss:$16 sps:$4 sm:$0xff]  }
 0x356   :  { %v3607_v24 = vld [vmem:[#allocation13 + $0x1e4] ss:$16 sps:$4 sm:$0xff]  }
 0x357   :  { %1445 = vmatprep.mubr.bf16.mxu0 %v1006_v25  ;;  %1488 = vmatprep.mubr.bf16.mxu1 %v1006_v25  ;;  %v3605_v25 = vld [vmem:[#allocation13 + $0x1e0] ss:$16 sps:$4 sm:$0xff]  }
 0x358   :  { %1446 = vmatmul.mubr.bf16.vlgmr.msra.gmra.mrb[12].mxu0 %v1005_v50  ;;  %1489 = vmatmul.mubr.bf16.vlgmr.msra.gmra.mrb[4].mxu1 %v1005_v50  ;;  %v3610_v50 = vld [vmem:[#allocation13 + $0x1ec] ss:$16 sps:$4 sm:$0xff]  }
 0x359   :  { %2366 = vmatpush1.bf16.msra.mxu0 %v3515_v26  ;;  %2452 = vmatpush1.bf16.msra.mxu1 %v3518_v28  ;;  %v3608_v26 = vld [vmem:[#allocation13 + $0x1e8] ss:$16 sps:$4 sm:$0xff]   ;;  %v3613_v28 = vld [vmem:[#allocation13 + $0x204] ss:$16 sps:$4 sm:$0xff]  }
 0x35a   :  { %2367 = vmatprep.subr.bf16.mxu0 %v3523_v30  ;;  %2453 = vmatprep.subr.bf16.mxu1 %v3526_v31  ;;  %v3616_v30 = vld [vmem:[#allocation13 + $0x20c] ss:$16 sps:$4 sm:$0xff]   ;;  %v1083_v31 = vsub.s32 2, %v4379_v14 }
 0x35d   :  { %2368 = vmatpush1.bf16.msra.mxu0 %v3521_v33  ;;  %2454 = vmatpush1.bf16.msra.mxu1 %v3524_v34  ;;  %v1071_v33 = vld [vmem:[%s4524_s11] sm:$0xf]  ;;  %v1087_v34 = vsub.s32 3, %v4379_v14 }
 0x35e   :  { %2369 = vmatprep.subr.bf16.mxu0 %v3529_v36  ;;  %2455 = vmatprep.subr.bf16.mxu1 %v3532_v40  ;;  %v1076_v36 = vrot.slane %v1071_v33, %v4382_v27  ;;  %v1084_v40 = vrot.slane %v1071_v33, %v1083_v31 }
 0x361   :  { %2370 = vmatpush1.bf16.msra.mxu0 %v3527_v41  ;;  %2456 = vmatpush1.bf16.msra.mxu1 %v3530_v42  ;;  %v1080_v41 = vrot.slane %v1071_v33, %v4388_v29  ;;  %v1088_v42 = vrot.slane %v1071_v33, %v1087_v34 }
 0x362   :  { %2371 = vmatprep.subr.bf16.mxu0 %v3535_v43  ;;  %2457 = vmatprep.subr.bf16.mxu1 %v3538_v44 }
 0x365   :  { %2372 = vmatpush1.bf16.msra.mxu0 %v3533_v45  ;;  %2458 = vmatpush1.bf16.msra.mxu1 %v3536_v46 }
 0x366   :  { %2373 = vmatprep.subr.bf16.mxu0 %v3541_v47  ;;  %2459 = vmatprep.subr.bf16.mxu1 %v3544_v48 }
 0x369   :  { %2374 = vmatpush1.bf16.msra.mxu0 %v3539_v49  ;;  %2460 = vmatpush1.bf16.msra.mxu1 %v3542_v51 }
 0x36a   :  { %2375 = vmatprep.subr.bf16.mxu0 %v3547_v52  ;;  %2461 = vmatprep.subr.bf16.mxu1 %v3550_v53 }
 0x36d   :  { %2376 = vmatpush1.bf16.msra.mxu0 %v3545_v54  ;;  %2462 = vmatpush1.bf16.msra.mxu1 %v3548_v37 }
 0x36e   :  { %2377 = vmatprep.subr.bf16.mxu0 %v3553_v56  ;;  %2463 = vmatprep.subr.bf16.mxu1 %v3556_v55 }
 0x371   :  { %2378 = vmatpush1.bf16.msra.mxu0 %v3551_v58  ;;  %2464 = vmatpush1.bf16.msra.mxu1 %v3554_v61 }
 0x372   :  { %2379 = vmatprep.subr.bf16.mxu0 %v3559_v59  ;;  %2465 = vmatprep.subr.bf16.mxu1 %v3562_v63 }
 0x375   :  { %2380 = vmatpush1.bf16.msra.mxu0 %v3557_v16  ;;  %2466 = vmatpush1.bf16.msra.mxu1 %v3560_v32 }
 0x376   :  { %2381 = vmatprep.subr.bf16.mxu0 %v3565_v39  ;;  %2467 = vmatprep.subr.bf16.mxu1 %v3568_v0 }
 0x379   :  { %2382 = vmatpush1.bf16.msra.mxu0 %v3563_v60  ;;  %2468 = vmatpush1.bf16.msra.mxu1 %v3566_v62 }
 0x37a   :  { %2383 = vmatprep.subr.bf16.mxu0 %v3571_v38  ;;  %2469 = vmatprep.subr.bf16.mxu1 %v3574_v1 }
 0x37d   :  { %2384 = vmatpush1.bf16.msra.mxu0 %v3569_v2  ;;  %2470 = vmatpush1.bf16.msra.mxu1 %v3572_v3 }
 0x37e   :  { %2385 = vmatprep.subr.bf16.mxu0 %v3577_v5  ;;  %2471 = vmatprep.subr.bf16.mxu1 %v3580_v6 }
 0x381   :  { %2386 = vmatpush1.bf16.msra.mxu0 %v3575_v7  ;;  %2472 = vmatpush1.bf16.msra.mxu1 %v3578_v8 }
 0x382   :  { %2387 = vmatprep.subr.bf16.mxu0 %v3583_v4  ;;  %2473 = vmatprep.subr.bf16.mxu1 %v3586_v9 }
 0x385   :  { %2388 = vmatpush1.bf16.msra.mxu0 %v3581_v10  ;;  %2474 = vmatpush1.bf16.msra.mxu1 %v3584_v11 }
 0x386   :  { %2389 = vmatprep.subr.bf16.mxu0 %v3589_v12  ;;  %2475 = vmatprep.subr.bf16.mxu1 %v3592_v35 }
 0x389   :  { %2390 = vmatpush1.bf16.msra.mxu0 %v3587_v13  ;;  %2476 = vmatpush1.bf16.msra.mxu1 %v3590_v15 }
 0x38a   :  { %2391 = vmatprep.subr.bf16.mxu0 %v3595_v17  ;;  %2477 = vmatprep.subr.bf16.mxu1 %v3598_v18 }
 0x38d   :  { %2392 = vmatpush1.bf16.msra.mxu0 %v3593_v19  ;;  %2478 = vmatpush1.bf16.msra.mxu1 %v3596_v20 }
 0x38e   :  { %2393 = vmatprep.subr.bf16.mxu0 %v3601_v57  ;;  %2479 = vmatprep.subr.bf16.mxu1 %v3604_v21 }
 0x391   :  { %2394 = vmatpush1.bf16.msra.mxu0 %v3599_v22  ;;  %2480 = vmatpush1.bf16.msra.mxu1 %v3602_v23 }
 0x392   :  { %2395 = vmatprep.subr.bf16.mxu0 %v3607_v24  ;;  %2481 = vmatprep.subr.bf16.mxu1 %v3610_v50 }
 0x395   :  { %2396 = vmatpush1.bf16.msra.mxu0 %v3605_v25  ;;  %2482 = vmatpush1.bf16.msra.mxu1 %v3608_v26 }
 0x396   :  { %2408 = vmatprep.subr.bf16.mxu0 %v3613_v28  ;;  %2494 = vmatprep.subr.bf16.mxu1 %v3616_v30 }
 0x42b   :  { %v1447_v43 = vpop.f32.mrb[12].mxu0  ;;  %v1490_v44 = vpop.f32.mrb[4].mxu1 }
 0x42c   :  { %v4412_v45 = vadd.f32 %v1447_v43, %v1076_v36  ;;  %v4414_v46 = vadd.f32 %v1490_v44, %v1084_v40  ;;  %v1449_v47 = vpop.f32.mrb[13].mxu0  ;;  %v1492_v48 = vpop.f32.mrb[5].mxu1 }
 0x42d   :  { %v4416_v49 = vadd.f32 %v1449_v47, %v1080_v41  ;;  %v4418_v51 = vadd.f32 %v1492_v48, %v1088_v42  ;;  %v1451_v52 = vpop.f32.mrb[14].mxu0  ;;  %v1494_v53 = vpop.f32.mrb[6].mxu1 }
 0x42e   :  { %v1507_v54 = vmul.f32 %v4412_v45, %v4412_v45  ;;  %v1509_v37 = vmul.f32 %v4414_v46, %v4414_v46  ;;  %v1453_v56 = vpop.f32.mrb[15].mxu0  ;;  %v1496_v55 = vpop.f32.mrb[7].mxu1  ;;  %v1452_v59 = vadd.f32 %v1451_v52, %v1076_v36  ;;  %v1495_v63 = vadd.f32 %v1494_v53, %v1084_v40 }
 0x42f   :  { %v1508_v58 = vmul.f32 %v4416_v49, %v4416_v49  ;;  %v1510_v61 = vmul.f32 %v4418_v51, %v4418_v51  ;;  %v1454_v39 = vadd.f32 %v1453_v56, %v1080_v41  ;;  %v4430_v0 = vadd.f32 %v1496_v55, %v1088_v42 }
 0x430   :  { %v1515_v16 = vmul.f32 %v1507_v54, %v4412_v45  ;;  %v1517_v32 = vmul.f32 %v1509_v37, %v4414_v46  ;;  %v1511_v38 = vmul.f32 %v1452_v59, %v1452_v59  ;;  %v1513_v3 = vmul.f32 %v1495_v63, %v1495_v63 }
 0x431   :  { %v1516_v60 = vmul.f32 %v1508_v58, %v4416_v49  ;;  %v1518_v62 = vmul.f32 %v1510_v61, %v4418_v51  ;;  %v1512_v8 = vmul.f32 %v1454_v39, %v1454_v39  ;;  %v1514_v11 = vmul.f32 %v4430_v0, %v4430_v0 }
 0x432   :  { %v1523_v1 = vmul.f32 0.044715, %v1515_v16  ;;  %v1525_v2 = vmul.f32 0.044715, %v1517_v32  ;;  %v1519_v7 = vmul.f32 %v1511_v38, %v1452_v59  ;;  %v1521_v10 = vmul.f32 %v1513_v3, %v1495_v63 }
 0x433   :  { %v1524_v5 = vmul.f32 0.044715, %v1516_v60  ;;  %v1526_v6 = vmul.f32 0.044715, %v1518_v62  ;;  %v1520_v15 = vmul.f32 %v1512_v8, %v1454_v39  ;;  %v1522_v20 = vmul.f32 %v1514_v11, %v4430_v0  ;;  %v3614_v11 = vld [vmem:[#allocation13 + $0x208] ss:$16 sps:$4 sm:$0xff]  }
 0x434   :  { %v1531_v4 = vadd.f32 %v1523_v1, %v4412_v45  ;;  %v1533_v9 = vadd.f32 %v1525_v2, %v4414_v46  ;;  %v1527_v13 = vmul.f32 0.044715, %v1519_v7  ;;  %v1529_v19 = vmul.f32 0.044715, %v1521_v10  ;;  %v3611_v10 = vld [vmem:[#allocation13 + $0x200] ss:$16 sps:$4 sm:$0xff]  }
 0x435   :  { %v1532_v12 = vadd.f32 %v1524_v5, %v4416_v49  ;;  %v1534_v35 = vadd.f32 %v1526_v6, %v4418_v51  ;;  %v1528_v23 = vmul.f32 0.044715, %v1520_v15  ;;  %v1530_v50 = vmul.f32 0.044715, %v1522_v20  ;;  %v3625_v15 = vld [vmem:[#allocation13 + $0x244] ss:$16 sps:$4 sm:$0xff]  }
 0x436   :  { %v1539_v17 = vmul.f32 0.7978846, %v1531_v4  ;;  %v1541_v18 = vmul.f32 0.7978846, %v1533_v9  ;;  %v1535_v22 = vadd.f32 %v1527_v13, %v1452_v59  ;;  %v1537_v24 = vadd.f32 %v1529_v19, %v1495_v63  ;;  %v3620_v13 = vld [vmem:[#allocation13 + $0x228] ss:$16 sps:$4 sm:$0xff]  }
 0x437   :  { %v1540_v57 = vmul.f32 0.7978846, %v1532_v12  ;;  %v1542_v21 = vmul.f32 0.7978846, %v1534_v35  ;;  %v1536_v26 = vadd.f32 %v1528_v23, %v1454_v39  ;;  %v1538_v30 = vadd.f32 %v1530_v50, %v4430_v0  ;;  %v3619_v35 = vld [vmem:[#allocation13 + $0x224] ss:$16 sps:$4 sm:$0xff]  }
 0x438   :  { %3771 = vtanh.f32 %v1539_v17  ;;  %v1543_v25 = vmul.f32 0.7978846, %v1535_v22  ;;  %v1545_v28 = vmul.f32 0.7978846, %v1537_v24  ;;  %v1499_v48 = vmul.f32 0.5, %v4412_v45 }
 0x439   :  { %3773 = vtanh.f32 %v1541_v18  ;;  %v1544_v33 = vmul.f32 0.7978846, %v1536_v26  ;;  %v1546_v36 = vmul.f32 0.7978846, %v1538_v30  ;;  %v1501_v52 = vmul.f32 0.5, %v4414_v46 }
 0x43a   :  { %3775 = vtanh.f32 %v1540_v57  ;;  %v1503_v37 = vmul.f32 0.5, %v1452_v59  ;;  %v1505_v56 = vmul.f32 0.5, %v1495_v63  ;;  %v1500_v16 = vmul.f32 0.5, %v4416_v49  ;;  %v3628_v17 = vld [vmem:[#allocation13 + $0x24c] ss:$16 sps:$4 sm:$0xff]  }
 0x43b   :  { %3777 = vtanh.f32 %v1542_v21  ;;  %v1504_v32 = vmul.f32 0.5, %v1454_v39  ;;  %v1502_v45 = vmul.f32 0.5, %v4418_v51  ;;  %v1506_v46 = vmul.f32 0.5, %v4430_v0  ;;  %v3622_v51 = vld [vmem:[#allocation13 + $0x22c] ss:$16 sps:$4 sm:$0xff]  }
 0x43c   :  { %3779 = vtanh.f32 %v1543_v25  ;;  %v3617_v0 = vld [vmem:[#allocation13 + $0x220] ss:$16 sps:$4 sm:$0xff]   ;;  %v3626_v19 = vld [vmem:[#allocation13 + $0x248] ss:$16 sps:$4 sm:$0xff]   ;;  %v3631_v20 = vld [vmem:[#allocation13 + $0x264] ss:$16 sps:$4 sm:$0xff]  }
 0x43d   :  { %3781 = vtanh.f32 %v1545_v28  ;;  %v3623_v18 = vld [vmem:[#allocation13 + $0x240] ss:$16 sps:$4 sm:$0xff]   ;;  %v3634_v57 = vld [vmem:[#allocation13 + $0x26c] ss:$16 sps:$4 sm:$0xff]   ;;  %v3632_v22 = vld [vmem:[#allocation13 + $0x268] ss:$16 sps:$4 sm:$0xff]  }
 0x43e   :  { %3783 = vtanh.f32 %v1544_v33  ;;  %v3629_v21 = vld [vmem:[#allocation13 + $0x260] ss:$16 sps:$4 sm:$0xff]   ;;  %v3637_v23 = vld [vmem:[#allocation13 + $0x284] ss:$16 sps:$4 sm:$0xff]   ;;  %v3640_v24 = vld [vmem:[#allocation13 + $0x28c] ss:$16 sps:$4 sm:$0xff]  }
 0x43f   :  { %3785 = vtanh.f32 %v1546_v36  ;;  %v3635_v50 = vld [vmem:[#allocation13 + $0x280] ss:$16 sps:$4 sm:$0xff]   ;;  %v3638_v25 = vld [vmem:[#allocation13 + $0x288] ss:$16 sps:$4 sm:$0xff]   ;;  %v3643_v26 = vld [vmem:[#allocation13 + $0x2a4] ss:$16 sps:$4 sm:$0xff]  }
 0x440   :  { %v3646_v28 = vld [vmem:[#allocation13 + $0x2ac] ss:$16 sps:$4 sm:$0xff]   ;;  %v3641_v30 = vld [vmem:[#allocation13 + $0x2a0] ss:$16 sps:$4 sm:$0xff]   ;;  %v3644_v33 = vld [vmem:[#allocation13 + $0x2a8] ss:$16 sps:$4 sm:$0xff]  }
 0x441   :  { %v3649_v36 = vld [vmem:[#allocation13 + $0x2c4] ss:$16 sps:$4 sm:$0xff]  }
 0x442   :  { %v3772_v40 = vpop.eup %3771 }
 0x443   :  { %v3774_v41 = vpop.eup %3773  ;;  %v1555_v44 = vadd.f32 1.0, %v3772_v40  ;;  %v3652_v40 = vld [vmem:[#allocation13 + $0x2cc] ss:$16 sps:$4 sm:$0xff]  }
 0x444   :  { %v3776_v42 = vpop.eup %3775  ;;  %v1557_v53 = vadd.f32 1.0, %v3774_v41  ;;  %v3647_v41 = vld [vmem:[#allocation13 + $0x2c0] ss:$16 sps:$4 sm:$0xff]  }
 0x445   :  { %v3778_v43 = vpop.eup %3777  ;;  %v1556_v55 = vadd.f32 1.0, %v3776_v42  ;;  %v1563_v2 = vmul.f32 %v1555_v44, %v1499_v48  ;;  %v3650_v42 = vld [vmem:[#allocation13 + $0x2c8] ss:$16 sps:$4 sm:$0xff]   ;;  %v3658_v44 = vld [vmem:[#allocation13 + $0x2ec] ss:$16 sps:$4 sm:$0xff]  }
 0x446   :  { %v3780_v47 = vpop.eup %3779  ;;  %v1558_v60 = vadd.f32 1.0, %v3778_v43  ;;  %v1565_v6 = vmul.f32 %v1557_v53, %v1501_v52  ;;  %v3655_v43 = vld [vmem:[#allocation13 + $0x2e4] ss:$16 sps:$4 sm:$0xff]   ;;  %v3656_v48 = vld [vmem:[#allocation13 + $0x2e8] ss:$16 sps:$4 sm:$0xff]  }
 0x447   :  { %v3782_v54 = vpop.eup %3781  ;;  %v1559_v58 = vadd.f32 1.0, %v3780_v47  ;;  %v1564_v63 = vmul.f32 %v1556_v55, %v1500_v16  ;;  %v3653_v47 = vld [vmem:[#allocation13 + $0x2e0] ss:$16 sps:$4 sm:$0xff]   ;;  %v3661_v52 = vld [vmem:[#allocation13 + $0x304] ss:$16 sps:$4 sm:$0xff]  }
 0x448   :  { %v3784_v61 = vpop.eup %3783  ;;  %v1561_v62 = vadd.f32 1.0, %v3782_v54  ;;  %v1566_v4 = vmul.f32 %v1558_v60, %v1502_v45  ;;  %v3664_v53 = vld [vmem:[#allocation13 + $0x30c] ss:$16 sps:$4 sm:$0xff]   ;;  %v3659_v54 = vld [vmem:[#allocation13 + $0x300] ss:$16 sps:$4 sm:$0xff]  }
 0x449   :  { %v3786_v38 = vpop.eup %3785  ;;  %v1560_v1 = vadd.f32 1.0, %v3784_v61  ;;  %v1567_v3 = vmul.f32 %v1559_v58, %v1503_v37  ;;  %v3662_v37 = vld [vmem:[#allocation13 + $0x308] ss:$16 sps:$4 sm:$0xff]   ;;  %v3670_v55 = vld [vmem:[#allocation13 + $0x32c] ss:$16 sps:$4 sm:$0xff]  }
 0x44a   :  { %v1562_v5 = vadd.f32 1.0, %v3786_v38  ;;  %v1569_v59 = vmul.f32 %v1561_v62, %v1505_v56  ;;  %v3667_v56 = vld [vmem:[#allocation13 + $0x324] ss:$16 sps:$4 sm:$0xff]   ;;  %v3665_v58 = vld [vmem:[#allocation13 + $0x320] ss:$16 sps:$4 sm:$0xff]  }
 0x44b   :  { %v1568_v7 = vmul.f32 %v1560_v1, %v1504_v32  ;;  %v1571_v8 = vpack.c.bf16 %v1567_v3, %v1563_v2  ;;  %v3668_v61 = vld [vmem:[#allocation13 + $0x328] ss:$16 sps:$4 sm:$0xff]   ;;  %v3673_v16 = vld [vmem:[#allocation13 + $0x344] ss:$16 sps:$4 sm:$0xff]   ;;  %v3676_v32 = vld [vmem:[#allocation13 + $0x34c] ss:$16 sps:$4 sm:$0xff]  }
 0x44c   :  { %v1570_v9 = vmul.f32 %v1562_v5, %v1506_v46  ;;  %v4447_v49 = vpack.c.bf16 %v1569_v59, %v1565_v6  ;;  %v3671_v60 = vld [vmem:[#allocation13 + $0x340] ss:$16 sps:$4 sm:$0xff]   ;;  %v3674_v62 = vld [vmem:[#allocation13 + $0x348] ss:$16 sps:$4 sm:$0xff]   ;;  %v3679_v38 = vld [vmem:[#allocation13 + $0x364] ss:$16 sps:$4 sm:$0xff]  }
 0x44d   :  { %v1572_v39 = vpack.c.bf16 %v1568_v7, %v1564_v63  ;;  %v3682_v1 = vld [vmem:[#allocation13 + $0x36c] ss:$16 sps:$4 sm:$0xff]   ;;  %v3677_v2 = vld [vmem:[#allocation13 + $0x360] ss:$16 sps:$4 sm:$0xff]   ;;  %v3680_v3 = vld [vmem:[#allocation13 + $0x368] ss:$16 sps:$4 sm:$0xff]  }
 0x44e   :  { %v1574_v12 = vpack.c.bf16 %v1570_v9, %v1566_v4  ;;  %v3685_v45 = vld [vmem:[#allocation13 + $0x384] ss:$16 sps:$4 sm:$0xff]   ;;  %v3688_v46 = vld [vmem:[#allocation13 + $0x38c] ss:$16 sps:$4 sm:$0xff]   ;;  %v3683_v5 = vld [vmem:[#allocation13 + $0x380] ss:$16 sps:$4 sm:$0xff]  }
 0x44f   :  { %2397 = vmatprep.mubr.bf16.mxu0 %v1572_v39  ;;  %2483 = vmatprep.mubr.bf16.mxu1 %v1572_v39  ;;  %v3686_v6 = vld [vmem:[#allocation13 + $0x388] ss:$16 sps:$4 sm:$0xff]   ;;  %v3691_v59 = vld [vmem:[#allocation13 + $0x3a4] ss:$16 sps:$4 sm:$0xff]   ;;  %v3694_v63 = vld [vmem:[#allocation13 + $0x3ac] ss:$16 sps:$4 sm:$0xff]  }
 0x450   :  { %2398 = vmatmul.mubr.bf16.vlgmr.msra.gmra.mrb[16].mxu0 %v1571_v8  ;;  %2484 = vmatmul.mubr.bf16.vlgmr.msra.gmra.mrb[8].mxu1 %v1571_v8  ;;  %v3689_v7 = vld [vmem:[#allocation13 + $0x3a0] ss:$16 sps:$4 sm:$0xff]   ;;  %v3692_v8 = vld [vmem:[#allocation13 + $0x3a8] ss:$16 sps:$4 sm:$0xff]   ;;  %v3697_v4 = vld [vmem:[#allocation13 + $0x3c4] ss:$16 sps:$4 sm:$0xff]  }
 0x451   :  { %2409 = vmatpush1.bf16.msra.mxu0 %v3611_v10  ;;  %2495 = vmatpush1.bf16.msra.mxu1 %v3614_v11  ;;  %v3700_v9 = vld [vmem:[#allocation13 + $0x3cc] ss:$16 sps:$4 sm:$0xff]   ;;  %v3695_v39 = vld [vmem:[#allocation13 + $0x3c0] ss:$16 sps:$4 sm:$0xff]   ;;  %v3698_v10 = vld [vmem:[#allocation13 + $0x3c8] ss:$16 sps:$4 sm:$0xff]  }
 0x452   :  { %2440 = vmatprep.mubr.bf16.mxu0 %v1574_v12  ;;  %2526 = vmatprep.mubr.bf16.mxu1 %v1574_v12  ;;  %v3703_v11 = vld [vmem:[#allocation13 + $0x3e4] ss:$16 sps:$4 sm:$0xff]   ;;  %v3706_v12 = vld [vmem:[#allocation13 + $0x3ec] ss:$16 sps:$4 sm:$0xff]  }
 0x453   :  { %2410 = vmatprep.subr.bf16.mxu0 %v3619_v35  ;;  %2496 = vmatprep.subr.bf16.mxu1 %v3622_v51  ;;  %v3701_v35 = vld [vmem:[#allocation13 + $0x3e0] ss:$16 sps:$4 sm:$0xff]   ;;  %v3704_v51 = vld [vmem:[#allocation13 + $0x3e8] ss:$16 sps:$4 sm:$0xff]  }
 0x455   :  { %2411 = vmatpush1.bf16.msra.mxu0 %v3617_v0  ;;  %2497 = vmatpush1.bf16.msra.mxu1 %v3620_v13  ;;  %v3707_v0 = vld [vmem:[#allocation14 + $0x40] sm:$0xff]  }
 0x456   :  { %2412 = vmatprep.subr.bf16.mxu0 %v3625_v15  ;;  %2498 = vmatprep.subr.bf16.mxu1 %v3628_v17  ;;  %v3708_v13 = vld [vmem:[#allocation14 + $0xc0] sm:$0xff]  }
 0x457   :  { %v3709_v15 = vld [vmem:[#allocation14] sm:$0xff]  }
 0x458   :  { %v3710_v17 = vld [vmem:[#allocation14 + $0x80] sm:$0xff]  }
 0x459   :  { %2413 = vmatpush1.bf16.msra.mxu0 %v3623_v18  ;;  %2499 = vmatpush1.bf16.msra.mxu1 %v3626_v19  ;;  %v3711_v18 = vld [vmem:[#allocation14 + $0x48] sm:$0xff]  }
 0x45a   :  { %2414 = vmatprep.subr.bf16.mxu0 %v3631_v20  ;;  %2500 = vmatprep.subr.bf16.mxu1 %v3634_v57  ;;  %v3712_v19 = vld [vmem:[#allocation14 + $0xc8] sm:$0xff]  }
 0x45b   :  { %v3713_v20 = vld [vmem:[#allocation14 + $0x8] sm:$0xff]  }
 0x45c   :  { %v3714_v57 = vld [vmem:[#allocation14 + $0x88] sm:$0xff]  }
 0x45d   :  { %2415 = vmatpush1.bf16.msra.mxu0 %v3629_v21  ;;  %2501 = vmatpush1.bf16.msra.mxu1 %v3632_v22  ;;  %v3715_v21 = vld [vmem:[#allocation14 + $0x50] sm:$0xff]  }
 0x45e   :  { %2416 = vmatprep.subr.bf16.mxu0 %v3637_v23  ;;  %2502 = vmatprep.subr.bf16.mxu1 %v3640_v24  ;;  %v3716_v22 = vld [vmem:[#allocation14 + $0xd0] sm:$0xff]   ;;  %v3719_v24 = vld [vmem:[#allocation14 + $0x58] sm:$0xff]  }
 0x45f   :  { %v3717_v23 = vld [vmem:[#allocation14 + $0x10] sm:$0xff]  }
 0x461   :  { %2417 = vmatpush1.bf16.msra.mxu0 %v3635_v50  ;;  %2503 = vmatpush1.bf16.msra.mxu1 %v3638_v25  ;;  %v3720_v50 = vld [vmem:[#allocation14 + $0xd8] sm:$0xff]  }
 0x462   :  { %2418 = vmatprep.subr.bf16.mxu0 %v3643_v26  ;;  %2504 = vmatprep.subr.bf16.mxu1 %v3646_v28  ;;  %v3721_v25 = vld [vmem:[#allocation14 + $0x18] sm:$0xff]   ;;  %v3723_v28 = vld [vmem:[#allocation14 + $0x60] sm:$0xff]  }
 0x463   :  { %v3722_v26 = vld [vmem:[#allocation14 + $0x98] sm:$0xff]  }
 0x465   :  { %2419 = vmatpush1.bf16.msra.mxu0 %v3641_v30  ;;  %2505 = vmatpush1.bf16.msra.mxu1 %v3644_v33  ;;  %v3724_v30 = vld [vmem:[#allocation14 + $0xe0] sm:$0xff]  }
 0x466   :  { %2420 = vmatprep.subr.bf16.mxu0 %v3649_v36  ;;  %2506 = vmatprep.subr.bf16.mxu1 %v3652_v40  ;;  %v3725_v33 = vld [vmem:[#allocation14 + $0x20] sm:$0xff]   ;;  %v3727_v40 = vld [vmem:[#allocation14 + $0x68] sm:$0xff]  }
 0x467   :  { %v3726_v36 = vld [vmem:[#allocation14 + $0xa0] sm:$0xff]  }
 0x469   :  { %2421 = vmatpush1.bf16.msra.mxu0 %v3647_v41  ;;  %2507 = vmatpush1.bf16.msra.mxu1 %v3650_v42  ;;  %v3728_v41 = vld [vmem:[#allocation14 + $0xe8] sm:$0xff]  }
 0x46a   :  { %2422 = vmatprep.subr.bf16.mxu0 %v3655_v43  ;;  %2508 = vmatprep.subr.bf16.mxu1 %v3658_v44  ;;  %v3729_v42 = vld [vmem:[#allocation14 + $0x28] sm:$0xff]   ;;  %v3731_v44 = vld [vmem:[#allocation14 + $0x70] sm:$0xff]  }
 0x46b   :  { %v3730_v43 = vld [vmem:[#allocation14 + $0xa8] sm:$0xff]  }
 0x46d   :  { %2423 = vmatpush1.bf16.msra.mxu0 %v3653_v47  ;;  %2509 = vmatpush1.bf16.msra.mxu1 %v3656_v48  ;;  %v3732_v47 = vld [vmem:[#allocation14 + $0xf0] sm:$0xff]  }
 0x46e   :  { %2424 = vmatprep.subr.bf16.mxu0 %v3661_v52  ;;  %2510 = vmatprep.subr.bf16.mxu1 %v3664_v53  ;;  %v3733_v48 = vld [vmem:[#allocation14 + $0x30] sm:$0xff]   ;;  %v3735_v53 = vld [vmem:[#allocation14 + $0x78] sm:$0xff]  }
 0x46f   :  { %v3734_v52 = vld [vmem:[#allocation14 + $0xb0] sm:$0xff]  }
 0x471   :  { %2425 = vmatpush1.bf16.msra.mxu0 %v3659_v54  ;;  %2511 = vmatpush1.bf16.msra.mxu1 %v3662_v37  ;;  %v3736_v54 = vld [vmem:[#allocation14 + $0xf8] sm:$0xff]  }
 0x472   :  { %2426 = vmatprep.subr.bf16.mxu0 %v3667_v56  ;;  %2512 = vmatprep.subr.bf16.mxu1 %v3670_v55  ;;  %v3737_v37 = vld [vmem:[#allocation14 + $0x38] sm:$0xff]   ;;  %v1703_v55 = vld [vmem:[%s4526_s13] sm:$0xf] }
 0x473   :  { %v3738_v56 = vld [vmem:[#allocation14 + $0xb8] sm:$0xff]  }
 0x475   :  { %2427 = vmatpush1.bf16.msra.mxu0 %v3665_v58  ;;  %2513 = vmatpush1.bf16.msra.mxu1 %v3668_v61  ;;  %v1708_v58 = vrot.slane %v1703_v55, %v4382_v27  ;;  %v1716_v61 = vrot.slane %v1703_v55, %v1083_v31 }
 0x476   :  { %2428 = vmatprep.subr.bf16.mxu0 %v3673_v16  ;;  %2514 = vmatprep.subr.bf16.mxu1 %v3676_v32  ;;  %v1712_v16 = vrot.slane %v1703_v55, %v4388_v29  ;;  %v1720_v32 = vrot.slane %v1703_v55, %v1087_v34 }
 0x479   :  { %2429 = vmatpush1.bf16.msra.mxu0 %v3671_v60  ;;  %2515 = vmatpush1.bf16.msra.mxu1 %v3674_v62 }
 0x47a   :  { %2430 = vmatprep.subr.bf16.mxu0 %v3679_v38  ;;  %2516 = vmatprep.subr.bf16.mxu1 %v3682_v1 }
 0x47d   :  { %2431 = vmatpush1.bf16.msra.mxu0 %v3677_v2  ;;  %2517 = vmatpush1.bf16.msra.mxu1 %v3680_v3 }
 0x47e   :  { %2432 = vmatprep.subr.bf16.mxu0 %v3685_v45  ;;  %2518 = vmatprep.subr.bf16.mxu1 %v3688_v46 }
 0x481   :  { %2433 = vmatpush1.bf16.msra.mxu0 %v3683_v5  ;;  %2519 = vmatpush1.bf16.msra.mxu1 %v3686_v6 }
 0x482   :  { %2434 = vmatprep.subr.bf16.mxu0 %v3691_v59  ;;  %2520 = vmatprep.subr.bf16.mxu1 %v3694_v63 }
 0x485   :  { %2435 = vmatpush1.bf16.msra.mxu0 %v3689_v7  ;;  %2521 = vmatpush1.bf16.msra.mxu1 %v3692_v8 }
 0x486   :  { %2436 = vmatprep.subr.bf16.mxu0 %v3697_v4  ;;  %2522 = vmatprep.subr.bf16.mxu1 %v3700_v9 }
 0x489   :  { %2437 = vmatpush1.bf16.msra.mxu0 %v3695_v39  ;;  %2523 = vmatpush1.bf16.msra.mxu1 %v3698_v10 }
 0x48a   :  { %2438 = vmatprep.subr.bf16.mxu0 %v3703_v11  ;;  %2524 = vmatprep.subr.bf16.mxu1 %v3706_v12 }
 0x48d   :  { %2439 = vmatpush1.bf16.msra.mxu0 %v3701_v35  ;;  %2525 = vmatpush1.bf16.msra.mxu1 %v3704_v51 }
 0x48e   :  { %3281 = vmatprep.subr.bf16.mxu0 %v3707_v0  ;;  %3303 = vmatprep.subr.bf16.mxu1 %v3708_v13 }
 0x490   :  { %2441 = vmatmul.mubr.bf16.vlgmr.msra.gmra.mrb[16].mxu0 %v4447_v49  ;;  %2527 = vmatmul.mubr.bf16.vlgmr.msra.gmra.mrb[8].mxu1 %v4447_v49  ;;  %v3718_v49 = vld [vmem:[#allocation14 + $0x90] sm:$0xff]  }
 0x491   :  { %3282 = vmatpush3.bf16.msra.mxu0 %v3709_v15  ;;  %3304 = vmatpush3.bf16.msra.mxu1 %v3710_v17 }
 0x492   :  { %3283 = vmatprep.subr.bf16.mxu0 %v3711_v18  ;;  %3305 = vmatprep.subr.bf16.mxu1 %v3712_v19 }
 0x495   :  { %3284 = vmatpush3.bf16.msra.mxu0 %v3713_v20  ;;  %3306 = vmatpush3.bf16.msra.mxu1 %v3714_v57 }
 0x496   :  { %3285 = vmatprep.subr.bf16.mxu0 %v3715_v21  ;;  %3307 = vmatprep.subr.bf16.mxu1 %v3716_v22 }
 0x499   :  { %3286 = vmatpush3.bf16.msra.mxu0 %v3717_v23  ;;  %3308 = vmatpush3.bf16.msra.mxu1 %v3718_v49 }
 0x49a   :  { %3287 = vmatprep.subr.bf16.mxu0 %v3719_v24  ;;  %3309 = vmatprep.subr.bf16.mxu1 %v3720_v50 }
 0x49d   :  { %3288 = vmatpush3.bf16.msra.mxu0 %v3721_v25  ;;  %3310 = vmatpush3.bf16.msra.mxu1 %v3722_v26 }
 0x49e   :  { %3289 = vmatprep.subr.bf16.mxu0 %v3723_v28  ;;  %3311 = vmatprep.subr.bf16.mxu1 %v3724_v30 }
 0x4a1   :  { %3290 = vmatpush3.bf16.msra.mxu0 %v3725_v33  ;;  %3312 = vmatpush3.bf16.msra.mxu1 %v3726_v36 }
 0x4a2   :  { %3291 = vmatprep.subr.bf16.mxu0 %v3727_v40  ;;  %3313 = vmatprep.subr.bf16.mxu1 %v3728_v41 }
 0x4a5   :  { %3292 = vmatpush3.bf16.msra.mxu0 %v3729_v42  ;;  %3314 = vmatpush3.bf16.msra.mxu1 %v3730_v43 }
 0x4a6   :  { %3293 = vmatprep.subr.bf16.mxu0 %v3731_v44  ;;  %3315 = vmatprep.subr.bf16.mxu1 %v3732_v47 }
 0x4a9   :  { %3294 = vmatpush3.bf16.msra.mxu0 %v3733_v48  ;;  %3316 = vmatpush3.bf16.msra.mxu1 %v3734_v52 }
 0x4aa   :  { %3295 = vmatprep.subr.bf16.mxu0 %v3735_v53  ;;  %3317 = vmatprep.subr.bf16.mxu1 %v3736_v54 }
 0x4ad   :  { %3296 = vmatpush3.bf16.msra.mxu0 %v3737_v37  ;;  %3318 = vmatpush3.bf16.msra.mxu1 %v3738_v56 }
 0x563   :  { %v2442_v60 = vpop.f32.mrb[16].mxu0  ;;  %v2528_v62 = vpop.f32.mrb[8].mxu1 }
 0x564   :  { %v4460_v38 = vadd.f32 %v2442_v60, %v1708_v58  ;;  %v4462_v1 = vadd.f32 %v2528_v62, %v1716_v61  ;;  %v2444_v2 = vpop.f32.mrb[17].mxu0  ;;  %v2530_v3 = vpop.f32.mrb[9].mxu1 }
 0x565   :  { %v4464_v45 = vadd.f32 %v2444_v2, %v1712_v16  ;;  %v4466_v46 = vadd.f32 %v2530_v3, %v1720_v32  ;;  %v2446_v27 = vpop.f32.mrb[18].mxu0  ;;  %v2532_v5 = vpop.f32.mrb[10].mxu1 }
 0x566   :  { %v2545_v29 = vmul.f32 %v4460_v38, %v4460_v38  ;;  %v2547_v14 = vmul.f32 %v4462_v1, %v4462_v1  ;;  %v2448_v31 = vpop.f32.mrb[19].mxu0  ;;  %v2534_v34 = vpop.f32.mrb[11].mxu1  ;;  %v3339_v63 = vadd.f32 %v2446_v27, %v1708_v58  ;;  %v3343_v7 = vadd.f32 %v2532_v5, %v1716_v61 }
 0x567   :  { %v2546_v6 = vmul.f32 %v4464_v45, %v4464_v45  ;;  %v2548_v59 = vmul.f32 %v4466_v46, %v4466_v46  ;;  %v3340_v9 = vadd.f32 %v2448_v31, %v1712_v16  ;;  %v4478_v39 = vadd.f32 %v2534_v34, %v1720_v32 }
 0x568   :  { %v2553_v8 = vmul.f32 %v4460_v38, %v2545_v29  ;;  %v2555_v4 = vmul.f32 %v4462_v1, %v2547_v14  ;;  %v2549_v12 = vmul.f32 %v3339_v63, %v3339_v63  ;;  %v2551_v0 = vmul.f32 %v3343_v7, %v3343_v7 }
 0x569   :  { %v2554_v10 = vmul.f32 %v4464_v45, %v2546_v6  ;;  %v2556_v11 = vmul.f32 %v4466_v46, %v2548_v59  ;;  %v2550_v18 = vmul.f32 %v3340_v9, %v3340_v9  ;;  %v2552_v21 = vmul.f32 %v4478_v39, %v4478_v39 }
 0x56a   :  { %v2561_v35 = vmul.f32 0.044715, %v2553_v8  ;;  %v2563_v51 = vmul.f32 0.044715, %v2555_v4  ;;  %v2557_v17 = vmul.f32 %v3339_v63, %v2549_v12  ;;  %v2559_v57 = vmul.f32 %v3343_v7, %v2551_v0 }
 0x56b   :  { %v2562_v13 = vmul.f32 0.044715, %v2554_v10  ;;  %v2564_v15 = vmul.f32 0.044715, %v2556_v11  ;;  %v2558_v24 = vmul.f32 %v3340_v9, %v2550_v18  ;;  %v2560_v28 = vmul.f32 %v4478_v39, %v2552_v21 }
 0x56c   :  { %v2569_v19 = vadd.f32 %v4460_v38, %v2561_v35  ;;  %v2571_v20 = vadd.f32 %v4462_v1, %v2563_v51  ;;  %v2565_v49 = vmul.f32 0.044715, %v2557_v17  ;;  %v2567_v26 = vmul.f32 0.044715, %v2559_v57  ;;  %v2973_v17 = vpop.permute.xlu1 %2972 }
 0x56d   :  { %v2570_v22 = vadd.f32 %v4464_v45, %v2562_v13  ;;  %v2572_v23 = vadd.f32 %v4466_v46, %v2564_v15  ;;  %v2566_v40 = vmul.f32 0.044715, %v2558_v24  ;;  %v2568_v42 = vmul.f32 0.044715, %v2560_v28 }
 0x56e   :  { %v2577_v50 = vmul.f32 0.7978846, %v2569_v19  ;;  %v2579_v25 = vmul.f32 0.7978846, %v2571_v20  ;;  %v2573_v36 = vadd.f32 %v3339_v63, %v2565_v49  ;;  %v2575_v41 = vadd.f32 %v3343_v7, %v2567_v26 }
 0x56f   :  { %v2578_v30 = vmul.f32 0.7978846, %v2570_v22  ;;  %v2580_v33 = vmul.f32 0.7978846, %v2572_v23  ;;  %v2574_v44 = vadd.f32 %v3340_v9, %v2566_v40  ;;  %v2576_v48 = vadd.f32 %v4478_v39, %v2568_v42 }
 0x570   :  { %3787 = vtanh.f32 %v2577_v50  ;;  %v2581_v43 = vmul.f32 0.7978846, %v2573_v36  ;;  %v2583_v47 = vmul.f32 0.7978846, %v2575_v41  ;;  %v2537_v16 = vmul.f32 0.5, %v4460_v38  ;;  %v2978_v40 = vpop.permute.xlu1 %2977 }
 0x571   :  { %3789 = vtanh.f32 %v2579_v25  ;;  %v2582_v52 = vmul.f32 0.7978846, %v2574_v44  ;;  %v2584_v53 = vmul.f32 0.7978846, %v2576_v48  ;;  %v2539_v32 = vmul.f32 0.5, %v4462_v1 }
 0x572   :  { %3791 = vtanh.f32 %v2578_v30  ;;  %v2541_v2 = vmul.f32 0.5, %v3339_v63  ;;  %v2543_v3 = vmul.f32 0.5, %v3343_v7  ;;  %v2538_v14 = vmul.f32 0.5, %v4464_v45 }
 0x573   :  { %3793 = vtanh.f32 %v2580_v33  ;;  %v2542_v31 = vmul.f32 0.5, %v3340_v9  ;;  %v2540_v4 = vmul.f32 0.5, %v4466_v46  ;;  %v2544_v1 = vmul.f32 0.5, %v4478_v39  ;;  %v3242_v39 = vld [vmem:[%s4528_s15] ss:$0 sm:$0xff]  ;;  %s3979_s15 = scalar_lea.vmem %s2990_s12, 256 }
 0x574   :  { %3795 = vtanh.f32 %v2581_v43  ;;  %p3980_p8 = scmp.ne.s32.totalorder %s2990_s12, %s3979_s15  ;;  %p3985_p10 = scmp.lt.s32.totalorder %s3979_s15, %s3979_s15 }
 0x575   :  { %3797 = vtanh.f32 %v2583_v47 }
 0x576   :  { %3799 = vtanh.f32 %v2582_v52  ;;  %p3986_p11 = por %p3985_p10, %p3984_p9 }
 0x577   :  { %3801 = vtanh.f32 %v2584_v53 }
 0x578   :  { %p3987_p12 = pnand %p3986_p11, %p3980_p8 }
 0x57a   :  { %v3788_v54 = vpop.eup %3787 }
 0x57b   :  { %v3790_v37 = vpop.eup %3789  ;;  %v2593_v58 = vadd.f32 1.0, %v3788_v54 }
 0x57c   :  { %v3792_v56 = vpop.eup %3791  ;;  %v2595_v60 = vadd.f32 1.0, %v3790_v37 }
 0x57d   :  { %v3794_v55 = vpop.eup %3793  ;;  %v2594_v27 = vadd.f32 1.0, %v3792_v56  ;;  %v2601_v10 = vmul.f32 %v2593_v58, %v2537_v16 }
 0x57e   :  { %v3796_v61 = vpop.eup %3795  ;;  %v2596_v34 = vadd.f32 1.0, %v3794_v55  ;;  %v2603_v12 = vmul.f32 %v2595_v60, %v2539_v32 }
 0x57f   :  { %v3798_v62 = vpop.eup %3797  ;;  %v2597_v5 = vadd.f32 1.0, %v3796_v61  ;;  %v2602_v7 = vmul.f32 %v2594_v27, %v2538_v14 }
 0x580   :  { %v3800_v29 = vpop.eup %3799  ;;  %v2599_v6 = vadd.f32 1.0, %v3798_v62  ;;  %v2604_v0 = vmul.f32 %v2596_v34, %v2540_v4 }
 0x581   :  { %v3802_v59 = vpop.eup %3801  ;;  %v2598_v8 = vadd.f32 1.0, %v3800_v29  ;;  %v2605_v38 = vmul.f32 %v2597_v5, %v2541_v2 }
 0x582   :  { %v2600_v11 = vadd.f32 1.0, %v3802_v59  ;;  %v2607_v63 = vmul.f32 %v2599_v6, %v2543_v3 }
 0x583   :  { %v2606_v35 = vmul.f32 %v2598_v8, %v2542_v31  ;;  %v2609_v51 = vpack.c.bf16 %v2605_v38, %v2601_v10 }
 0x584   :  { %v2608_v13 = vmul.f32 %v2600_v11, %v2544_v1  ;;  %v2611_v45 = vpack.c.bf16 %v2607_v63, %v2603_v12 }
 0x585   :  { %v2610_v9 = vpack.c.bf16 %v2606_v35, %v2602_v7 }
 0x586   :  { %v2612_v15 = vpack.c.bf16 %v2608_v13, %v2604_v0 }
 0x587   :  { %2908 = vmatprep.mubr.bf16.mxu0 %v2610_v9 }
 0x588   :  { %2949 = vmatprep.mubr.bf16.mxu1 %v2612_v15  ;;  %2909 = vmatmul.mubr.bf16.vlgmr.msra.gmra.mrb[20].mxu0 %v2609_v51 }
 0x589   :  { %2950 = vmatmul.mubr.bf16.vlgmr.msra.gmra.mrb[12].mxu1 %v2611_v45 }
 0x65b   :  { %v3297_v46 = vpop.f32.mrb[20].mxu0 }
 0x65c   :  { %v3319_v18 = vpop.f32.mrb[12].mxu1  ;;  %v3298_v19 = vpop.f32.mrb[21].mxu0 }
 0x65d   :  { %v3299_v20 = vadd.f32 %v3298_v19, %v3297_v46  ;;  %v3320_v57 = vpop.f32.mrb[13].mxu1  ;;  %v3300_v21 = vpop.f32.mrb[22].mxu0 }
 0x65e   :  { %v3321_v22 = vadd.f32 %v3320_v57, %v3319_v18  ;;  %v3322_v23 = vpop.f32.mrb[14].mxu1  ;;  %v3301_v49 = vpop.f32.mrb[23].mxu0 }
 0x65f   :  { %v2911_v24 = vadd.f32 %v3299_v20, %v3242_v39  ;;  %v3302_v50 = vadd.f32 %v3301_v49, %v3300_v21  ;;  %v3323_v25 = vpop.f32.mrb[15].mxu1 }
 0x660   :  { %v3324_v26 = vadd.f32 %v3323_v25, %v3322_v23 }
 0x661   :  { %v2952_v28 = vadd.f32 %v3321_v22, %v2911_v24  ;;  %v2914_v30 = vadd.f32 %v3302_v50, %v3242_v39 }
 0x663   :  { %v2980_v33 = vmul.f32 %v2973_v17, %v2952_v28  ;;  %v2955_v36 = vadd.f32 %v3324_v26, %v2914_v30 }
 0x665   :  { %2982 = vst [vmem:[#allocation16] sm:$0xff] %v2980_v33  ;;  %v2981_v41 = vmul.f32 %v2978_v40, %v2955_v36 }
 0x667   :  { %2983 = vst [vmem:[#allocation16 + $0x8] sm:$0xff] %v2981_v41 }
 0x668   :  { %3990 = shalt.err (!%p3987_p12)
}
 0x669   :  { %s4539_s19 = sld [smem:[#allocation24_spill]] }
 0x66f   :  { %s3991_s14 = scalar_lea.hbm %s4539_s19, 256 }
 0x670   :  { %p3992_p13 = scmp.ne.s32.totalorder %s4539_s19, %s3991_s14  ;;  %p3995_p0 = scmp.lt.u32.totalorder %s3991_s14, %s4539_s19 }
 0x672   :  { %p3997_p1 = pnand %p3995_p0, %p3992_p13 }
 0x674   :  { %4000 = shalt.err (!%p3997_p1)
}
 0x675   :  { %2995 = dma.vmem_to_hbm [thread:$0]  %s2990_s12, 256, %s4539_s19, [#allocation4], %s4021_s10, %s4021_s10, %s4022_s24  }
 0x676   :  { %4011 = dma.done.wait [#allocation4], 256  }
 0x677   :  { %4012 = vsyncadd [#allocation4], 4294967040 }
 0x678   :  { %2999 = vsyncpa [#allocation3], 1 }
 0x679   :  { %3000 = vsyncpa [#allocation6], 1 }
 0x67a   :  { %3001 = vsyncpa [#allocation9], 1 }
 0x67b   :  { %3002 = vsyncpa [#allocation12], 1 }
 0x67c   :  { %3003 = vsyncpa [#allocation15], 1 }
 0x67d   :  { %3004 = vsyncpa [#allocation4], 1 }

</bundles_post_ra>
